<compile_context>
chip_gen: v7x
topology: tpu7x:2x2x1
jax: 0.10.0
libtpu: 0.0.40
codegen_flags: <defaults>
</compile_context>

<pallas_src>
import jax
import jax.numpy as jnp
from jax.experimental import pallas as pl
from jax.experimental.pallas import tpu as pltpu

INPUT_DIM = 16
HIDDEN = 64          # hidden_dim default of the module
NHEAD = 2
NUM_LAYERS = 2
DIM_FF = 2048        # nn.TransformerEncoderLayer default dim_feedforward
EPS = 1e-5           # nn.LayerNorm default eps
N_ROWS = 16          # batch of samples
F_CHUNK = 512        # feed-forward streaming chunk

_LAYER_ROWS = 6      # per-layer packed rows: b_attn, ln1w, ln1b, bff2, ln2w, ln2b
_GLOB_ROWS = 3       # global packed rows:    b1, fc2-weight-row, b2 (broadcast)


def _layernorm(x, w, b):
    mu = jnp.mean(x, axis=-1, keepdims=True)
    xc = x - mu
    var = jnp.mean(xc * xc, axis=-1, keepdims=True)   # biased variance (PyTorch LayerNorm)
    return xc * jax.lax.rsqrt(var + EPS) * w + b


def _kernel(x_ref, w1_ref, wattn_ref, wff1_ref, wff2p_ref, bff1_ref,
            lsmall_ref, glob_ref, o_ref, h_ref):
    l = pl.program_id(0)
    last = pl.num_programs(0) - 1

    b1 = glob_ref[0:1, :]
    w2_row = glob_ref[1:2, :]
    b2 = glob_ref[2:3, 0:1]

    # ---- fc1 + ReLU (first grid step only); result carried in VMEM scratch ----
    @pl.when(l == 0)
    def _():
        h0 = jnp.dot(x_ref[...], w1_ref[...], preferred_element_type=jnp.float32) + b1
        h_ref[...] = jnp.maximum(h0, 0.0)

    ls = lsmall_ref[0]                 # (6, HIDDEN) per-layer small params
    b_attn = ls[0:1, :]
    ln1w = ls[1:2, :]
    ln1b = ls[2:3, :]
    bff2 = ls[3:4, :]
    ln2w = ls[4:5, :]
    ln2b = ls[5:6, :]

    h = h_ref[...]

    # ---- self-attention block (seq_len == 1 -> exactly linear; V*O fused offline) ----
    sa = jnp.dot(h, wattn_ref[0], preferred_element_type=jnp.float32) + b_attn
    h = _layernorm(h + sa, ln1w, ln1b)

    # ---- feed-forward block, DIM_FF streamed in F_CHUNK-wide chunks ----
    # bf16 weights / bf16 dot inputs, f32 MXU accumulation; elementwise math stays f32.
    h_bf = h.astype(jnp.bfloat16)
    n_rows = h.shape[0]
    acc = jnp.zeros((n_rows, NUM_LAYERS * HIDDEN), jnp.float32)
    for c in range(DIM_FF // F_CHUNK):            # static chunk loop (static, aligned slices)
        c0 = c * F_CHUNK
        w1c = wff1_ref[0, :, c0:c0 + F_CHUNK]     # (HIDDEN, F_CHUNK) bf16
        b1c = bff1_ref[0, :, c0:c0 + F_CHUNK]     # (1, F_CHUNK) f32
        w2c = wff2p_ref[c0:c0 + F_CHUNK, :]       # (F_CHUNK, 2*HIDDEN) bf16, lane-dense
        ffc = jnp.dot(h_bf, w1c, preferred_element_type=jnp.float32) + b1c
        ffc = jnp.maximum(ffc, 0.0).astype(jnp.bfloat16)   # fused bias+ReLU+cast
        acc = acc + jnp.dot(ffc, w2c, preferred_element_type=jnp.float32)

    # wff2 of both layers is packed side-by-side along lanes; pick this layer's 64-lane half.
    ff = jnp.where(l == 0, acc[:, :HIDDEN], acc[:, HIDDEN:]) + bff2
    h = _layernorm(h + ff, ln2w, ln2b)
    h_ref[...] = h

    # ---- fc2 -> scalar per row (last grid step only) ----
    @pl.when(l == last)
    def _():
        o_ref[...] = jnp.sum(h * w2_row, axis=-1, keepdims=True) + b2


def pack_params(p):
    """One-time prep (outside the kernel): fuse V*O, pack lane-dense wff2, pack small vectors."""
    E, L = HIDDEN, NUM_LAYERS
    hi = jax.lax.Precision.HIGHEST
    wv = p["wqkv"][:, :, 2 * E:]                    # (L, E, E) — only V is ever used
    bv = p["bqkv"][:, :, 2 * E:]                    # (L, 1, E)
    # seq_len == 1 -> attention is exactly linear: fuse V and O projections offline.
    w_attn = jnp.einsum("lij,ljk->lik", wv, p["wo"], precision=hi).astype(jnp.float32)
    b_attn = (jnp.einsum("lij,ljk->lik", bv, p["wo"], precision=hi) + p["bo"]).astype(jnp.float32)

    # lane-dense wff2: both layers side-by-side -> (DIM_FF, L*E) bf16, layer l in lanes E*l:E*(l+1)
    wff2p = jnp.concatenate([p["wff2"][l] for l in range(L)], axis=1).astype(jnp.bfloat16)

    layer_small = jnp.stack(
        [jnp.concatenate([b_attn[l], p["ln1w"][l], p["ln1b"][l],
                          p["bff2"][l], p["ln2w"][l], p["ln2b"][l]], axis=0)
         for l in range(L)], axis=0).astype(jnp.float32)            # (L, 6, E)

    glob = jnp.concatenate(
        [p["b1"], p["w2"].T, jnp.broadcast_to(p["b2"], (1, E))], axis=0
    ).astype(jnp.float32)                                            # (3, E)

    return {
        "w1": p["w1"].astype(jnp.float32),           # (INPUT_DIM, E)
        "w_attn": w_attn,                            # (L, E, E) f32, fused V*O
        "wff1": p["wff1"].astype(jnp.bfloat16),      # (L, E, DIM_FF) bf16, lane-dense
        "wff2p": wff2p,                              # (DIM_FF, L*E) bf16, lane-dense
        "bff1": p["bff1"].astype(jnp.float32),       # (L, 1, DIM_FF) f32
        "layer_small": layer_small,                  # (L, 6, E) f32
        "glob": glob,                                # (3, E) f32
    }


def transformer_predictor(x, packed):
    n, d = x.shape
    E, L, F = HIDDEN, NUM_LAYERS, DIM_FF
    assert L == 2 and packed["wff2p"].shape == (F, L * E)

    args = (x, packed["w1"], packed["w_attn"], packed["wff1"], packed["wff2p"],
            packed["bff1"], packed["layer_small"], packed["glob"])

    in_specs = [
        pl.BlockSpec((n, d),              lambda l: (0, 0)),      # x            (resident)
        pl.BlockSpec((d, E),              lambda l: (0, 0)),      # w1           (resident)
        pl.BlockSpec((1, E, E),           lambda l: (l, 0, 0)),   # fused attn W (per layer)
        pl.BlockSpec((1, E, F),           lambda l: (l, 0, 0)),   # wff1         (per layer)
        pl.BlockSpec((F, L * E),          lambda l: (0, 0)),      # wff2 packed  (resident)
        pl.BlockSpec((1, 1, F),           lambda l: (l, 0, 0)),   # bff1         (per layer)
        pl.BlockSpec((1, _LAYER_ROWS, E), lambda l: (l, 0, 0)),   # layer small  (per layer)
        pl.BlockSpec((_GLOB_ROWS, E),     lambda l: (0, 0)),      # global small (resident)
    ]
    out_spec = pl.BlockSpec((n, 1), lambda l: (0, 0))

    return pl.pallas_call(
        _kernel,
        out_shape=jax.ShapeDtypeStruct((n, 1), jnp.float32),
        grid_spec=pltpu.PrefetchScalarGridSpec(
            num_scalar_prefetch=0,
            grid=(L,),                                   # layers pipelined: next layer's weights
            in_specs=in_specs,                           # DMA while current layer computes
            out_specs=out_spec,
            scratch_shapes=[pltpu.VMEM((n, E), jnp.float32)]),   # h carried across layers
        compiler_params=pltpu.CompilerParams(
            dimension_semantics=("arbitrary",)),
    )(*args)


def init_params(key):
    """Deterministic synthetic parameters (weights pre-transposed so y = x @ W + b)."""
    ks = iter(jax.random.split(key, 24))
    nrm = lambda shape, s=0.05: (s * jax.random.normal(next(ks), shape)).astype(jnp.float32)
    L, E, F = NUM_LAYERS, HIDDEN, DIM_FF
    return {
        "w1":   nrm((INPUT_DIM, E)),      "b1":   nrm((1, E)),
        "wqkv": nrm((L, E, 3 * E)),       "bqkv": nrm((L, 1, 3 * E)),
        "wo":   nrm((L, E, E)),           "bo":   nrm((L, 1, E)),
        "ln1w": jnp.ones((L, 1, E), jnp.float32),
        "ln1b": jnp.zeros((L, 1, E), jnp.float32),
        "wff1": nrm((L, E, F)),           "bff1": nrm((L, 1, F)),
        "wff2": nrm((L, F, E)),           "bff2": nrm((L, 1, E)),
        "ln2w": jnp.ones((L, 1, E), jnp.float32),
        "ln2b": jnp.zeros((L, 1, E), jnp.float32),
        "w2":   nrm((E, 1)),              "b2":   nrm((1, 1)),
    }


def reference(x, p):
    """Pure-JAX reference with the *full* attention math (softmax over the seq_len=1 axis).
    FF weights are rounded through bf16 (same stored values the kernel streams); all math f32."""
    E, H = HIDDEN, NHEAD
    dh = E // H
    wff1 = p["wff1"].astype(jnp.bfloat16).astype(jnp.float32)
    wff2 = p["wff2"].astype(jnp.bfloat16).astype(jnp.float32)
    h = jnp.maximum(x @ p["w1"] + p["b1"], 0.0)
    for l in range(NUM_LAYERS):
        qkv = h @ p["wqkv"][l] + p["bqkv"][l]
        q, k, v = qkv[:, :E], qkv[:, E:2 * E], qkv[:, 2 * E:]
        n = h.shape[0]
        qh = q.reshape(n, H, dh); kh = k.reshape(n, H, dh); vh = v.reshape(n, H, dh)
        scores = jnp.einsum("nhd,nhd->nh", qh, kh) / jnp.sqrt(float(dh))
        w = jax.nn.softmax(scores[..., None], axis=-1)        # key axis has size 1 -> all ones
        attn = (w * vh).reshape(n, E)
        sa = attn @ p["wo"][l] + p["bo"][l]
        h = _layernorm(h + sa, p["ln1w"][l], p["ln1b"][l])
        ff = jnp.maximum(h @ wff1[l] + p["bff1"][l], 0.0)
        ff = ff @ wff2[l] + p["bff2"][l]
        h = _layernorm(h + ff, p["ln2w"][l], p["ln2b"][l])
    return h @ p["w2"] + p["b2"]


if __name__ == "__main__":
    key = jax.random.PRNGKey(0)
    kx, kp = jax.random.split(key)
    x = jax.random.normal(kx, (N_ROWS, INPUT_DIM), dtype=jnp.float32)
    params = init_params(kp)

    packed = pack_params(params)            # one-time prep, outside the pallas_call
    out = jax.block_until_ready(transformer_predictor(x, packed))

    ref = reference(x, params)
    assert out.shape == (N_ROWS, 1), out.shape
    max_err = float(jnp.max(jnp.abs(out - ref)))
    # bf16 FF-weight streaming + bf16-cast activations at the FF dots + fused V*O reassociation
    assert max_err < 2e-2, max_err
    print("KERNEL_OK")
</pallas_src>

<mosaic_0001>
module attributes {stable_mosaic.version = 11 : i64} {
  func.func @_kernel(%arg0: i32, %arg1: memref<16x16xf32, #tpu.memory_space<vmem>>, %arg2: memref<16x64xf32, #tpu.memory_space<vmem>>, %arg3: memref<1x64x64xf32, #tpu.memory_space<vmem>>, %arg4: memref<1x64x2048xbf16, #tpu.memory_space<vmem>>, %arg5: memref<2048x128xbf16, #tpu.memory_space<vmem>>, %arg6: memref<1x1x2048xf32, #tpu.memory_space<vmem>>, %arg7: memref<1x6x64xf32, #tpu.memory_space<vmem>>, %arg8: memref<3x64xf32, #tpu.memory_space<vmem>>, %arg9: memref<16x1xf32, #tpu.memory_space<vmem>>, %arg10: memref<16x64xf32, #tpu.memory_space<vmem>>) attributes {dimension_semantics = [#tpu.dimension_semantics<arbitrary>], iteration_bounds = array<i64: 2>, scalar_prefetch = 0 : i64, scratch_operands = 1 : i64, tpu.core_type = #tpu.core_type<tc>, window_params = [{pipeline_mode = #tpu.pipeline_mode<synchronous>, transform_indices = @transform_0, window_bounds = array<i64: 16, 16>}, {pipeline_mode = #tpu.pipeline_mode<synchronous>, transform_indices = @transform_1, window_bounds = array<i64: 16, 64>}, {transform_indices = @transform_2, window_bounds = array<i64: 1, 64, 64>}, {transform_indices = @transform_3, window_bounds = array<i64: 1, 64, 2048>}, {pipeline_mode = #tpu.pipeline_mode<synchronous>, transform_indices = @transform_4, window_bounds = array<i64: 2048, 128>}, {transform_indices = @transform_5, window_bounds = array<i64: 1, 1, 2048>}, {transform_indices = @transform_6, window_bounds = array<i64: 1, 6, 64>}, {pipeline_mode = #tpu.pipeline_mode<synchronous>, transform_indices = @transform_7, window_bounds = array<i64: 3, 64>}, {pipeline_mode = #tpu.pipeline_mode<synchronous>, transform_indices = @transform_8, window_bounds = array<i64: 16, 1>}]} {
    %c0 = arith.constant 0 : index
    %c0_0 = arith.constant 0 : index
    %0 = vector.load %arg8[%c0, %c0_0] : memref<3x64xf32, #tpu.memory_space<vmem>>, vector<1x64xf32>
    %c1 = arith.constant 1 : index
    %c0_1 = arith.constant 0 : index
    %1 = vector.load %arg8[%c1, %c0_1] : memref<3x64xf32, #tpu.memory_space<vmem>>, vector<1x64xf32>
    %c2 = arith.constant 2 : index
    %c0_2 = arith.constant 0 : index
    %2 = vector.load %arg8[%c2, %c0_2] : memref<3x64xf32, #tpu.memory_space<vmem>>, vector<1x1xf32>
    %c0_i32 = arith.constant 0 : i32
    %3 = arith.cmpi eq, %arg0, %c0_i32 : i32
    %4 = arith.extui %3 : i1 to i32
    %c0_i32_3 = arith.constant 0 : i32
    %5 = arith.cmpi ne, %4, %c0_i32_3 : i32
    scf.if %5 {
      %c0_68 = arith.constant 0 : index
      %c0_69 = arith.constant 0 : index
      %126 = vector.load %arg1[%c0_68, %c0_69] : memref<16x16xf32, #tpu.memory_space<vmem>>, vector<16x16xf32>
      %c0_70 = arith.constant 0 : index
      %c0_71 = arith.constant 0 : index
      %127 = vector.load %arg2[%c0_70, %c0_71] : memref<16x64xf32, #tpu.memory_space<vmem>>, vector<16x64xf32>
      %cst_72 = arith.constant dense<0.000000e+00> : vector<16x64xf32>
      %128 = tpu.matmul %126, %127, %cst_72 {dimension_numbers = #tpu.dot_dimension_numbers<[1], [0], [0], [1], [0, 0, 1, 1], [], []>} : vector<16x16xf32>, vector<16x64xf32>, vector<16x64xf32> -> vector<16x64xf32>
      %129 = vector.broadcast %0 : vector<1x64xf32> to vector<16x64xf32>
      %130 = arith.addf %128, %129 : vector<16x64xf32>
      %cst_73 = arith.constant 0.000000e+00 : f32
      %131 = vector.broadcast %cst_73 : f32 to vector<16x64xf32>
      %132 = arith.maximumf %130, %131 : vector<16x64xf32>
      %c0_74 = arith.constant 0 : index
      %c0_75 = arith.constant 0 : index
      %133 = vector.load %arg10[%c0_74, %c0_75] : memref<16x64xf32, #tpu.memory_space<vmem>>, vector<16x64xf32>
      tpu.vector_store %arg10[%c0_74, %c0_75], %132 {strides = array<i32>} : memref<16x64xf32, #tpu.memory_space<vmem>>, vector<16x64xf32>,
    } else {
    }
    %c0_4 = arith.constant 0 : index
    %c0_5 = arith.constant 0 : index
    %c0_6 = arith.constant 0 : index
    %6 = vector.load %arg7[%c0_4, %c0_5, %c0_6] : memref<1x6x64xf32, #tpu.memory_space<vmem>>, vector<1x6x64xf32>
    %7 = vector.shape_cast %6 : vector<1x6x64xf32> to vector<6x64xf32>
    %8 = vector.extract_strided_slice %7 {offsets = [0, 0], sizes = [1, 64], strides = [1, 1]} : vector<6x64xf32> to vector<1x64xf32>
    %9 = vector.extract_strided_slice %7 {offsets = [1, 0], sizes = [1, 64], strides = [1, 1]} : vector<6x64xf32> to vector<1x64xf32>
    %10 = vector.extract_strided_slice %7 {offsets = [2, 0], sizes = [1, 64], strides = [1, 1]} : vector<6x64xf32> to vector<1x64xf32>
    %11 = vector.extract_strided_slice %7 {offsets = [3, 0], sizes = [1, 64], strides = [1, 1]} : vector<6x64xf32> to vector<1x64xf32>
    %12 = vector.extract_strided_slice %7 {offsets = [4, 0], sizes = [1, 64], strides = [1, 1]} : vector<6x64xf32> to vector<1x64xf32>
    %13 = vector.extract_strided_slice %7 {offsets = [5, 0], sizes = [1, 64], strides = [1, 1]} : vector<6x64xf32> to vector<1x64xf32>
    %c0_7 = arith.constant 0 : index
    %c0_8 = arith.constant 0 : index
    %14 = vector.load %arg10[%c0_7, %c0_8] : memref<16x64xf32, #tpu.memory_space<vmem>>, vector<16x64xf32>
    %c0_9 = arith.constant 0 : index
    %c0_10 = arith.constant 0 : index
    %c0_11 = arith.constant 0 : index
    %15 = vector.load %arg3[%c0_9, %c0_10, %c0_11] : memref<1x64x64xf32, #tpu.memory_space<vmem>>, vector<1x64x64xf32>
    %16 = vector.shape_cast %15 : vector<1x64x64xf32> to vector<64x64xf32>
    %cst = arith.constant dense<0.000000e+00> : vector<16x64xf32>
    %17 = tpu.matmul %14, %16, %cst {dimension_numbers = #tpu.dot_dimension_numbers<[1], [0], [0], [1], [0, 0, 1, 1], [], []>} : vector<16x64xf32>, vector<64x64xf32>, vector<16x64xf32> -> vector<16x64xf32>
    %18 = vector.broadcast %8 : vector<1x64xf32> to vector<16x64xf32>
    %19 = arith.addf %17, %18 : vector<16x64xf32>
    %20 = arith.addf %14, %19 : vector<16x64xf32>
    %cst_12 = arith.constant dense<0.000000e+00> : vector<16xf32>
    %21 = vector.multi_reduction <add>, %20, %cst_12 [1] : vector<16x64xf32> to vector<16xf32>
    %22 = vector.shape_cast %21 : vector<16xf32> to vector<16x1xf32>
    %cst_13 = arith.constant 6.400000e+01 : f32
    %23 = vector.broadcast %cst_13 : f32 to vector<16x1xf32>
    %24 = arith.divf %22, %23 : vector<16x1xf32>
    %25 = vector.broadcast %24 : vector<16x1xf32> to vector<16x64xf32>
    %26 = arith.subf %20, %25 : vector<16x64xf32>
    %27 = arith.mulf %26, %26 : vector<16x64xf32>
    %cst_14 = arith.constant dense<0.000000e+00> : vector<16xf32>
    %28 = vector.multi_reduction <add>, %27, %cst_14 [1] : vector<16x64xf32> to vector<16xf32>
    %29 = vector.shape_cast %28 : vector<16xf32> to vector<16x1xf32>
    %cst_15 = arith.constant 6.400000e+01 : f32
    %30 = vector.broadcast %cst_15 : f32 to vector<16x1xf32>
    %31 = arith.divf %29, %30 : vector<16x1xf32>
    %cst_16 = arith.constant 9.99999974E-6 : f32
    %32 = vector.broadcast %cst_16 : f32 to vector<16x1xf32>
    %33 = arith.addf %31, %32 : vector<16x1xf32>
    %34 = math.rsqrt %33 : vector<16x1xf32>
    %35 = vector.broadcast %34 : vector<16x1xf32> to vector<16x64xf32>
    %36 = arith.mulf %26, %35 : vector<16x64xf32>
    %37 = vector.broadcast %9 : vector<1x64xf32> to vector<16x64xf32>
    %38 = arith.mulf %36, %37 : vector<16x64xf32>
    %39 = vector.broadcast %10 : vector<1x64xf32> to vector<16x64xf32>
    %40 = arith.addf %38, %39 : vector<16x64xf32>
    %41 = arith.truncf %40 : vector<16x64xf32> to vector<16x64xbf16>
    %cst_17 = arith.constant 0.000000e+00 : f32
    %42 = vector.broadcast %cst_17 : f32 to vector<16x128xf32>
    %c0_18 = arith.constant 0 : index
    %c0_19 = arith.constant 0 : index
    %c0_20 = arith.constant 0 : index
    %43 = vector.load %arg4[%c0_18, %c0_19, %c0_20] : memref<1x64x2048xbf16, #tpu.memory_space<vmem>>, vector<1x64x512xbf16>
    %44 = vector.shape_cast %43 : vector<1x64x512xbf16> to vector<64x512xbf16>
    %c0_21 = arith.constant 0 : index
    %c0_22 = arith.constant 0 : index
    %c0_23 = arith.constant 0 : index
    %45 = vector.load %arg6[%c0_21, %c0_22, %c0_23] : memref<1x1x2048xf32, #tpu.memory_space<vmem>>, vector<1x1x512xf32>
    %46 = vector.shape_cast %45 : vector<1x1x512xf32> to vector<1x512xf32>
    %c0_24 = arith.constant 0 : index
    %c0_25 = arith.constant 0 : index
    %47 = vector.load %arg5[%c0_24, %c0_25] : memref<2048x128xbf16, #tpu.memory_space<vmem>>, vector<512x128xbf16>
    %cst_26 = arith.constant dense<0.000000e+00> : vector<16x512xf32>
    %48 = tpu.matmul %41, %44, %cst_26 {dimension_numbers = #tpu.dot_dimension_numbers<[1], [0], [0], [1], [0, 0, 1, 1], [], []>} : vector<16x64xbf16>, vector<64x512xbf16>, vector<16x512xf32> -> vector<16x512xf32>
    %49 = vector.broadcast %46 : vector<1x512xf32> to vector<16x512xf32>
    %50 = arith.addf %48, %49 : vector<16x512xf32>
    %cst_27 = arith.constant 0.000000e+00 : f32
    %51 = vector.broadcast %cst_27 : f32 to vector<16x512xf32>
    %52 = arith.maximumf %50, %51 : vector<16x512xf32>
    %53 = arith.truncf %52 : vector<16x512xf32> to vector<16x512xbf16>
    %cst_28 = arith.constant dense<0.000000e+00> : vector<16x128xf32>
    %54 = tpu.matmul %53, %47, %cst_28 {dimension_numbers = #tpu.dot_dimension_numbers<[1], [0], [0], [1], [0, 0, 1, 1], [], []>} : vector<16x512xbf16>, vector<512x128xbf16>, vector<16x128xf32> -> vector<16x128xf32>
    %55 = arith.addf %42, %54 : vector<16x128xf32>
    %c0_29 = arith.constant 0 : index
    %c0_30 = arith.constant 0 : index
    %c512 = arith.constant 512 : index
    %56 = vector.load %arg4[%c0_29, %c0_30, %c512] : memref<1x64x2048xbf16, #tpu.memory_space<vmem>>, vector<1x64x512xbf16>
    %57 = vector.shape_cast %56 : vector<1x64x512xbf16> to vector<64x512xbf16>
    %c0_31 = arith.constant 0 : index
    %c0_32 = arith.constant 0 : index
    %c512_33 = arith.constant 512 : index
    %58 = vector.load %arg6[%c0_31, %c0_32, %c512_33] : memref<1x1x2048xf32, #tpu.memory_space<vmem>>, vector<1x1x512xf32>
    %59 = vector.shape_cast %58 : vector<1x1x512xf32> to vector<1x512xf32>
    %c512_34 = arith.constant 512 : index
    %c0_35 = arith.constant 0 : index
    %60 = vector.load %arg5[%c512_34, %c0_35] : memref<2048x128xbf16, #tpu.memory_space<vmem>>, vector<512x128xbf16>
    %cst_36 = arith.constant dense<0.000000e+00> : vector<16x512xf32>
    %61 = tpu.matmul %41, %57, %cst_36 {dimension_numbers = #tpu.dot_dimension_numbers<[1], [0], [0], [1], [0, 0, 1, 1], [], []>} : vector<16x64xbf16>, vector<64x512xbf16>, vector<16x512xf32> -> vector<16x512xf32>
    %62 = vector.broadcast %59 : vector<1x512xf32> to vector<16x512xf32>
    %63 = arith.addf %61, %62 : vector<16x512xf32>
    %cst_37 = arith.constant 0.000000e+00 : f32
    %64 = vector.broadcast %cst_37 : f32 to vector<16x512xf32>
    %65 = arith.maximumf %63, %64 : vector<16x512xf32>
    %66 = arith.truncf %65 : vector<16x512xf32> to vector<16x512xbf16>
    %cst_38 = arith.constant dense<0.000000e+00> : vector<16x128xf32>
    %67 = tpu.matmul %66, %60, %cst_38 {dimension_numbers = #tpu.dot_dimension_numbers<[1], [0], [0], [1], [0, 0, 1, 1], [], []>} : vector<16x512xbf16>, vector<512x128xbf16>, vector<16x128xf32> -> vector<16x128xf32>
    %68 = arith.addf %55, %67 : vector<16x128xf32>
    %c0_39 = arith.constant 0 : index
    %c0_40 = arith.constant 0 : index
    %c1024 = arith.constant 1024 : index
    %69 = vector.load %arg4[%c0_39, %c0_40, %c1024] : memref<1x64x2048xbf16, #tpu.memory_space<vmem>>, vector<1x64x512xbf16>
    %70 = vector.shape_cast %69 : vector<1x64x512xbf16> to vector<64x512xbf16>
    %c0_41 = arith.constant 0 : index
    %c0_42 = arith.constant 0 : index
    %c1024_43 = arith.constant 1024 : index
    %71 = vector.load %arg6[%c0_41, %c0_42, %c1024_43] : memref<1x1x2048xf32, #tpu.memory_space<vmem>>, vector<1x1x512xf32>
    %72 = vector.shape_cast %71 : vector<1x1x512xf32> to vector<1x512xf32>
    %c1024_44 = arith.constant 1024 : index
    %c0_45 = arith.constant 0 : index
    %73 = vector.load %arg5[%c1024_44, %c0_45] : memref<2048x128xbf16, #tpu.memory_space<vmem>>, vector<512x128xbf16>
    %cst_46 = arith.constant dense<0.000000e+00> : vector<16x512xf32>
    %74 = tpu.matmul %41, %70, %cst_46 {dimension_numbers = #tpu.dot_dimension_numbers<[1], [0], [0], [1], [0, 0, 1, 1], [], []>} : vector<16x64xbf16>, vector<64x512xbf16>, vector<16x512xf32> -> vector<16x512xf32>
    %75 = vector.broadcast %72 : vector<1x512xf32> to vector<16x512xf32>
    %76 = arith.addf %74, %75 : vector<16x512xf32>
    %cst_47 = arith.constant 0.000000e+00 : f32
    %77 = vector.broadcast %cst_47 : f32 to vector<16x512xf32>
    %78 = arith.maximumf %76, %77 : vector<16x512xf32>
    %79 = arith.truncf %78 : vector<16x512xf32> to vector<16x512xbf16>
    %cst_48 = arith.constant dense<0.000000e+00> : vector<16x128xf32>
    %80 = tpu.matmul %79, %73, %cst_48 {dimension_numbers = #tpu.dot_dimension_numbers<[1], [0], [0], [1], [0, 0, 1, 1], [], []>} : vector<16x512xbf16>, vector<512x128xbf16>, vector<16x128xf32> -> vector<16x128xf32>
    %81 = arith.addf %68, %80 : vector<16x128xf32>
    %c0_49 = arith.constant 0 : index
    %c0_50 = arith.constant 0 : index
    %c1536 = arith.constant 1536 : index
    %82 = vector.load %arg4[%c0_49, %c0_50, %c1536] : memref<1x64x2048xbf16, #tpu.memory_space<vmem>>, vector<1x64x512xbf16>
    %83 = vector.shape_cast %82 : vector<1x64x512xbf16> to vector<64x512xbf16>
    %c0_51 = arith.constant 0 : index
    %c0_52 = arith.constant 0 : index
    %c1536_53 = arith.constant 1536 : index
    %84 = vector.load %arg6[%c0_51, %c0_52, %c1536_53] : memref<1x1x2048xf32, #tpu.memory_space<vmem>>, vector<1x1x512xf32>
    %85 = vector.shape_cast %84 : vector<1x1x512xf32> to vector<1x512xf32>
    %c1536_54 = arith.constant 1536 : index
    %c0_55 = arith.constant 0 : index
    %86 = vector.load %arg5[%c1536_54, %c0_55] : memref<2048x128xbf16, #tpu.memory_space<vmem>>, vector<512x128xbf16>
    %cst_56 = arith.constant dense<0.000000e+00> : vector<16x512xf32>
    %87 = tpu.matmul %41, %83, %cst_56 {dimension_numbers = #tpu.dot_dimension_numbers<[1], [0], [0], [1], [0, 0, 1, 1], [], []>} : vector<16x64xbf16>, vector<64x512xbf16>, vector<16x512xf32> -> vector<16x512xf32>
    %88 = vector.broadcast %85 : vector<1x512xf32> to vector<16x512xf32>
    %89 = arith.addf %87, %88 : vector<16x512xf32>
    %cst_57 = arith.constant 0.000000e+00 : f32
    %90 = vector.broadcast %cst_57 : f32 to vector<16x512xf32>
    %91 = arith.maximumf %89, %90 : vector<16x512xf32>
    %92 = arith.truncf %91 : vector<16x512xf32> to vector<16x512xbf16>
    %cst_58 = arith.constant dense<0.000000e+00> : vector<16x128xf32>
    %93 = tpu.matmul %92, %86, %cst_58 {dimension_numbers = #tpu.dot_dimension_numbers<[1], [0], [0], [1], [0, 0, 1, 1], [], []>} : vector<16x512xbf16>, vector<512x128xbf16>, vector<16x128xf32> -> vector<16x128xf32>
    %94 = arith.addf %81, %93 : vector<16x128xf32>
    %c0_i32_59 = arith.constant 0 : i32
    %95 = arith.cmpi eq, %arg0, %c0_i32_59 : i32
    %96 = vector.extract_strided_slice %94 {offsets = [0, 0], sizes = [16, 64], strides = [1, 1]} : vector<16x128xf32> to vector<16x64xf32>
    %97 = vector.extract_strided_slice %94 {offsets = [0, 64], sizes = [16, 64], strides = [1, 1]} : vector<16x128xf32> to vector<16x64xf32>
    %98 = arith.select %95, %96, %97 : vector<16x64xf32>
    %99 = vector.broadcast %11 : vector<1x64xf32> to vector<16x64xf32>
    %100 = arith.addf %98, %99 : vector<16x64xf32>
    %101 = arith.addf %40, %100 : vector<16x64xf32>
    %cst_60 = arith.constant dense<0.000000e+00> : vector<16xf32>
    %102 = vector.multi_reduction <add>, %101, %cst_60 [1] : vector<16x64xf32> to vector<16xf32>
    %103 = vector.shape_cast %102 : vector<16xf32> to vector<16x1xf32>
    %cst_61 = arith.constant 6.400000e+01 : f32
    %104 = vector.broadcast %cst_61 : f32 to vector<16x1xf32>
    %105 = arith.divf %103, %104 : vector<16x1xf32>
    %106 = vector.broadcast %105 : vector<16x1xf32> to vector<16x64xf32>
    %107 = arith.subf %101, %106 : vector<16x64xf32>
    %108 = arith.mulf %107, %107 : vector<16x64xf32>
    %cst_62 = arith.constant dense<0.000000e+00> : vector<16xf32>
    %109 = vector.multi_reduction <add>, %108, %cst_62 [1] : vector<16x64xf32> to vector<16xf32>
    %110 = vector.shape_cast %109 : vector<16xf32> to vector<16x1xf32>
    %cst_63 = arith.constant 6.400000e+01 : f32
    %111 = vector.broadcast %cst_63 : f32 to vector<16x1xf32>
    %112 = arith.divf %110, %111 : vector<16x1xf32>
    %cst_64 = arith.constant 9.99999974E-6 : f32
    %113 = vector.broadcast %cst_64 : f32 to vector<16x1xf32>
    %114 = arith.addf %112, %113 : vector<16x1xf32>
    %115 = math.rsqrt %114 : vector<16x1xf32>
    %116 = vector.broadcast %115 : vector<16x1xf32> to vector<16x64xf32>
    %117 = arith.mulf %107, %116 : vector<16x64xf32>
    %118 = vector.broadcast %12 : vector<1x64xf32> to vector<16x64xf32>
    %119 = arith.mulf %117, %118 : vector<16x64xf32>
    %120 = vector.broadcast %13 : vector<1x64xf32> to vector<16x64xf32>
    %121 = arith.addf %119, %120 : vector<16x64xf32>
    %c0_65 = arith.constant 0 : index
    %c0_66 = arith.constant 0 : index
    %122 = vector.load %arg10[%c0_65, %c0_66] : memref<16x64xf32, #tpu.memory_space<vmem>>, vector<16x64xf32>
    tpu.vector_store %arg10[%c0_65, %c0_66], %121 {strides = array<i32>} : memref<16x64xf32, #tpu.memory_space<vmem>>, vector<16x64xf32>,
    %c1_i32 = arith.constant 1 : i32
    %123 = arith.cmpi eq, %arg0, %c1_i32 : i32
    %124 = arith.extui %123 : i1 to i32
    %c0_i32_67 = arith.constant 0 : i32
    %125 = arith.cmpi ne, %124, %c0_i32_67 : i32
    scf.if %125 {
      %126 = vector.broadcast %1 : vector<1x64xf32> to vector<16x64xf32>
      %127 = arith.mulf %121, %126 : vector<16x64xf32>
      %cst_68 = arith.constant dense<0.000000e+00> : vector<16xf32>
      %128 = vector.multi_reduction <add>, %127, %cst_68 [1] : vector<16x64xf32> to vector<16xf32>
      %129 = vector.shape_cast %128 : vector<16xf32> to vector<16x1xf32>
      %130 = vector.broadcast %2 : vector<1x1xf32> to vector<16x1xf32>
      %131 = arith.addf %129, %130 : vector<16x1xf32>
      %c0_69 = arith.constant 0 : index
      %c0_70 = arith.constant 0 : index
      %132 = vector.load %arg9[%c0_69, %c0_70] : memref<16x1xf32, #tpu.memory_space<vmem>>, vector<16x1xf32>
      tpu.vector_store %arg9[%c0_69, %c0_70], %131 {strides = array<i32>} : memref<16x1xf32, #tpu.memory_space<vmem>>, vector<16x1xf32>,
    } else {
    }
    return
  }
  func.func @transform_0(%arg0: i32) -> (i32, i32) {
    %c0_i32 = arith.constant 0 : i32
    %c0_i32_0 = arith.constant 0 : i32
    %c0_i32_1 = arith.constant 0 : i32
    return %c0_i32, %c0_i32_0 : i32, i32
  }
  func.func @transform_1(%arg0: i32) -> (i32, i32) {
    %c0_i32 = arith.constant 0 : i32
    %c0_i32_0 = arith.constant 0 : i32
    %c0_i32_1 = arith.constant 0 : i32
    return %c0_i32, %c0_i32_0 : i32, i32
  }
  func.func @transform_2(%arg0: i32) -> (i32, i32, i32) {
    %c0_i32 = arith.constant 0 : i32
    %c0_i32_0 = arith.constant 0 : i32
    %c0_i32_1 = arith.constant 0 : i32
    return %arg0, %c0_i32, %c0_i32_0 : i32, i32, i32
  }
  func.func @transform_3(%arg0: i32) -> (i32, i32, i32) {
    %c0_i32 = arith.constant 0 : i32
    %c0_i32_0 = arith.constant 0 : i32
    %c0_i32_1 = arith.constant 0 : i32
    return %arg0, %c0_i32, %c0_i32_0 : i32, i32, i32
  }
  func.func @transform_4(%arg0: i32) -> (i32, i32) {
    %c0_i32 = arith.constant 0 : i32
    %c0_i32_0 = arith.constant 0 : i32
    %c0_i32_1 = arith.constant 0 : i32
    return %c0_i32, %c0_i32_0 : i32, i32
  }
  func.func @transform_5(%arg0: i32) -> (i32, i32, i32) {
    %c0_i32 = arith.constant 0 : i32
    %c0_i32_0 = arith.constant 0 : i32
    %c0_i32_1 = arith.constant 0 : i32
    return %arg0, %c0_i32, %c0_i32_0 : i32, i32, i32
  }
  func.func @transform_6(%arg0: i32) -> (i32, i32, i32) {
    %c0_i32 = arith.constant 0 : i32
    %c0_i32_0 = arith.constant 0 : i32
    %c0_i32_1 = arith.constant 0 : i32
    return %arg0, %c0_i32, %c0_i32_0 : i32, i32, i32
  }
  func.func @transform_7(%arg0: i32) -> (i32, i32) {
    %c0_i32 = arith.constant 0 : i32
    %c0_i32_0 = arith.constant 0 : i32
    %c0_i32_1 = arith.constant 0 : i32
    return %c0_i32, %c0_i32_0 : i32, i32
  }
  func.func @transform_8(%arg0: i32) -> (i32, i32) {
    %c0_i32 = arith.constant 0 : i32
    %c0_i32_0 = arith.constant 0 : i32
    %c0_i32_1 = arith.constant 0 : i32
    return %c0_i32, %c0_i32_0 : i32, i32
  }
}

</mosaic_0001>

<bundles_post_ra>
// kernel: tpu_custom_call.1
= control target key start
LH: loop header
LB: loop body
LE: loop exit
PB: predicated region body
PF: predicated region fallthrough
CT: control target
= control target key end

     0   :  { %s4532_s0 = inlined_call_operand.hbm [shape: f32[16,16], index: 0, kind: input, shape index: {}]   ;;  %s4533_s1 = inlined_call_operand.hbm [shape: f32[16,64], index: 1, kind: input, shape index: {}]   ;;  %s4534_s2 = inlined_call_operand.hbm [shape: f32[2,64,64], index: 2, kind: input, shape index: {}]   ;;  %s4535_s3 = inlined_call_operand.hbm [shape: bf16[2,64,2048], index: 3, kind: input, shape index: {}]   ;;  %s4536_s4 = inlined_call_operand.hbm [shape: bf16[2048,128], index: 4, kind: input, shape index: {}]   ;;  %s4537_s5 = inlined_call_operand.vmem [shape: f32[2,1,2048], index: 5, kind: input, shape index: {}]   ;;  %s4538_s6 = inlined_call_operand.vmem [shape: f32[2,6,64], index: 6, kind: input, shape index: {}]   ;;  %s4539_s7 = inlined_call_operand.vmem [shape: f32[3,64], index: 7, kind: input, shape index: {}]   ;;  %s4540_s8 = inlined_call_operand.vmem [shape: f32[16,1], index: 8, kind: output, shape index: {}]  }
   0x1   :  { %4550 = sst [smem:[#allocation16_spill]] %s4540_s8 }
   0x2   :  { %13 = vsyncpa [#allocation4], 0 }
   0x3   :  { %14 = vsyncpa [#allocation6], 0  ;;  %s4022_s27 = smov 0   ;;  %s4024_s28 = smov 0  }
   0x4   :  { %s4026_s29 = smov 0   ;;  %s4028_s30 = smov 0  }
   0x5 LB: > { %s4041_s9 = sadd.s32 4294967295, %s3963_s30   ;;  %s4044_s10 = sadd.s32 1, %s3963_s30   ;;  %s3963_s30 = sphi %s4028_s30, %s4574_s30   ;;  %s3959_s29 = sphi %s4026_s29, %s4578_s29   ;;  %s3955_s28 = sphi %s4024_s28, %s4577_s28   ;;  %s3951_s27 = sphi %s4022_s27, %s4576_s27  }
   0x6   : > { %4551 = sst [smem:[#allocation14_spill]] %s4044_s10  ;;  %s66_s11 = ssub.s32 %s3963_s30, %s4044_s10 }
   0x7   : > { %s69_s12 = sadd.s32 1, %s3959_s29  ;;  %p67_p0 = scmp.eq.s32.totalorder %s66_s11, 0 }
   0x8   : > { %p76_p1 = scmp.ne.s32.totalorder %s3959_s29, %s3955_s28  ;;  %p77_p2 = scmp.eq.s32.totalorder %s3963_s30, 0 }
   0x9   : > { %p82_p3 = scmp.ne.s32.totalorder %s3955_s28, %s3951_s27  ;;  %p4541_p5 = scmp.eq.s32.totalorder %s4041_s9, 0 }
   0xa   : > { %s4054_s13 = scalar_select %p67_p0, %s3959_s29, %s69_s12  }
   0xb   : > { %p4056_p4 = por %p77_p2, %p76_p1  ;;  %p3086_p6 = scmp.ge.s32.totalorder %s3963_s30, 1 }
   0xc   : > { %4552 = sst [smem:[#allocation15_spill]] %s4054_s13  ;;  %p234_p7 = scmp.lt.s32.totalorder %s3963_s30, 3 }
   0xd   : > { %p4065_p8 = por %p4541_p5, %p82_p3  ;;  %s3965_s17 = smov [#allocation3]  }
   0xe   : > { %p4070_p10 = pnand %p3086_p6, %p234_p7  ;;  %s246_s18 = sshll.u32 %s3965_s17, 4  ;;  %s247_s18 = int_to_ptr.vmem [resolvable:$true] %s246_s18 }
   0xf   : > { %s4554_s15 = scalar_select %p4065_p8, 1, 0 }
  0x10   : > { %s4555_s16 = scalar_select %p4070_p10, 1, 0 }
  0x11   : > { %p3570_p11 = pneg %p4070_p10  ;;  %p3590_p13 = scmp.lt.s32.totalorder %s3963_s30, 2 }
  0x12   : > { %s3773_s24 = scalar_lea.hbm %s4532_s0, 256 }
  0x13   : > { %p4078_p12 = pnand %p3570_p11, %p4541_p5  ;;  %p4086_p0 = pnand %p3590_p13, %p4056_p4 }
  0x14   : > { %p3774_p1 = scmp.ne.s32.totalorder %s4532_s0, %s3773_s24  ;;  %p3780_p6 = scmp.lt.u32.totalorder %s3773_s24, %s4532_s0 }
  0x15   : > { %s4556_s19 = scalar_select %p4078_p12, 1, 0 }
  0x16   : > { %s4557_s21 = scalar_select %p4086_p0, 1, 0 }
  0x17   : > { %p4098_p2 = pneg %p4078_p12 }
  0x19   : > { %p3776_p3 = pnand %p4098_p2, %p3774_p1 }
  0x1b   : > { %p3777_p4 = pneg %p3776_p3 }
  0x1d   : > { %p3782_p7 = pnand %p3780_p6, %p3777_p4 }
  0x1f   : > { %3785 = shalt.err (!%p3782_p7)
}
  0x20   : > { %s3786_s14 = scalar_lea.vmem %s247_s18, 256  ;;  %p3794_p5 = scmp.lt.s32.totalorder %s247_s18, %s247_s18 }
  0x21   : > { %p3787_p11 = scmp.ne.s32.totalorder %s247_s18, %s3786_s14  ;;  %p3795_p8 = scmp.lt.s32.totalorder %s3786_s14, %s3786_s14 }
  0x23   : > { %p3789_p13 = pnand %p3787_p11, %p4098_p2  ;;  %p3796_p10 = por %p3795_p8, %p3794_p5 }
  0x25   : > { %p3790_p9 = pneg %p3789_p13 }
  0x27   : > { %p3797_p0 = pnand %p3796_p10, %p3790_p9 }
  0x29   : > { %3800 = shalt.err (!%p3797_p0)
}
  0x2a   : > { %s3966_s17 = smov 128   ;;  %s3967_s22 = smov 8  }
  0x2b   : > { %3573 = dma.hbm_to_vmem [thread:$0]  (!%p4078_p12), %s4532_s0, 256, %s247_s18, [#allocation4], %s3966_s17, %s3966_s17, %s3967_s22  }
  0x2c   : > { %s3968_s25 = smov [#allocation5]   ;;  %s3801_s14 = scalar_lea.hbm %s4533_s1, 256 }
  0x2d   : > { %s259_s26 = sshll.u32 %s3968_s25, 4  ;;  %p3802_p5 = scmp.ne.s32.totalorder %s4533_s1, %s3801_s14  ;;  %s260_s26 = int_to_ptr.vmem [resolvable:$true] %s259_s26 }
  0x2e   : > { %p3808_p10 = scmp.lt.u32.totalorder %s3801_s14, %s4533_s1 }
  0x2f   : > { %p3804_p8 = pnand %p3802_p5, %p4098_p2 }
  0x31   : > { %p3805_p9 = pneg %p3804_p8 }
  0x33   : > { %p3810_p0 = pnand %p3808_p10, %p3805_p9 }
  0x35   : > { %3813 = shalt.err (!%p3810_p0)
}
  0x36   : > { %s3814_s18 = scalar_lea.vmem %s260_s26, 256  ;;  %p3822_p6 = scmp.lt.s32.totalorder %s260_s26, %s260_s26 }
  0x37   : > { %p3815_p1 = scmp.ne.s32.totalorder %s260_s26, %s3814_s18  ;;  %p3823_p7 = scmp.lt.s32.totalorder %s3814_s18, %s3814_s18 }
  0x39   : > { %p3817_p3 = pnand %p3815_p1, %p4098_p2  ;;  %p3824_p11 = por %p3823_p7, %p3822_p6 }
  0x3b   : > { %p3818_p4 = pneg %p3817_p3 }
  0x3d   : > { %p3825_p13 = pnand %p3824_p11, %p3818_p4 }
  0x3f   : > { %3828 = shalt.err (!%p3825_p13)
}
  0x40   : > { %3576 = dma.hbm_to_vmem [thread:$0]  (!%p4078_p12), %s4533_s1, 256, %s260_s26, [#allocation6], %s3966_s17, %s3966_s17, %s3967_s22  }
  0x41   : > { %s4548_s13 = sand.u32 1, %s3959_s29   ;;  %s3316_s20 = sshll.u32 %s3963_s30, 10 }
  0x42   : > { %s3091_s23 = sshll.u32 %s4548_s13, 6  ;;  %s4145_s11 = scalar_lea.hbm %s4534_s2, %s3316_s20 }
  0x43   : > { %s293_s12 = scalar_lea.vmem [#allocation7], %s3091_s23  ;;  %s3969_s18 = smov [#allocation9]  }
  0x44   : > { %s300_s14 = sshll.u32 %s293_s12, 4  ;;  %s272_s8 = sshll.u32 %s3969_s18, 4  ;;  %s4147_s14 = int_to_ptr.vmem [resolvable:$true] %s300_s14  ;;  %s4149_s8 = int_to_ptr.vmem [resolvable:$true] %s272_s8 }
  0x45   : > { %s4559_s26 = sand.u32 1, %s3963_s30   ;;  %s3829_s13 = scalar_lea.hbm %s4145_s11, 1024 }
  0x46   : > { %s4153_s10 = scalar_lea.sflag [#allocation4], %s4559_s26  ;;  %p3830_p5 = scmp.ne.s32.totalorder %s4145_s11, %s3829_s13 }
  0x47   : > { %p4560_p8 = scmp.ne.s32.totalorder %s4557_s21, 0  ;;  %s3834_s24 = scalar_lea.hbm %s4534_s2, 2048 }
  0x48   : > { %p3835_p1 = scmp.lt.u32.totalorder %s4145_s11, %s4534_s2  ;;  %p3836_p3 = scmp.lt.u32.totalorder %s3834_s24, %s3829_s13 }
  0x49   : > { %p3831_p9 = pneg %p4560_p8  ;;  %p3838_p6 = scmp.lt.u32.totalorder %s3829_s13, %s4145_s11 }
  0x4a   : > { %p3837_p4 = por %p3836_p3, %p3835_p1 }
  0x4b   : > { %p3832_p10 = pnand %p3831_p9, %p3830_p5 }
  0x4c   : > { %p3839_p7 = por %p3838_p6, %p3837_p4 }
  0x4d   : > { %p3833_p0 = pneg %p3832_p10 }
  0x4f   : > { %p3840_p11 = pnand %p3839_p7, %p3833_p0 }
  0x51   : > { %3843 = shalt.err (!%p3840_p11)
}
  0x52   : > { %s3844_s18 = scalar_lea.vmem %s4147_s14, 1024  ;;  %s3970_s26 = smov [#allocation7]  }
  0x53   : > { %p3845_p13 = scmp.ne.s32.totalorder %s4147_s14, %s3844_s18  ;;  %s3849_s20 = sshll.u32 %s3970_s26, 4  ;;  %s3850_s20 = int_to_ptr.vmem [resolvable:$false] %s3849_s20 }
  0x54   : > { %s3851_s23 = scalar_lea.vmem %s3850_s20, 2048  ;;  %p3852_p12 = scmp.lt.s32.totalorder %s4147_s14, %s3850_s20 }
  0x55   : > { %p3847_p5 = pnand %p3845_p13, %p3831_p9  ;;  %p3853_p1 = scmp.lt.s32.totalorder %s3851_s23, %s3844_s18 }
  0x57   : > { %p3848_p10 = pneg %p3847_p5  ;;  %p3854_p3 = por %p3853_p1, %p3852_p12 }
  0x59   : > { %p3855_p4 = pnand %p3854_p3, %p3848_p10 }
  0x5b   : > { %3858 = shalt.err (!%p3855_p4)
}
  0x5c   : > { %3583 = dma.hbm_to_vmem [thread:$0]  (!%p4560_p8), %s4145_s11, 1024, %s4147_s14, %s4153_s10, %s3966_s17, %s3966_s17, %s3967_s22  }
  0x5d   : > { %s3859_s25 = scalar_lea.hbm %s4536_s4, 16384 }
  0x5e   : > { %p3860_p12 = scmp.ne.s32.totalorder %s4536_s4, %s3859_s25  ;;  %p3866_p7 = scmp.lt.u32.totalorder %s3859_s25, %s4536_s4 }
  0x60   : > { %p3862_p0 = pnand %p3860_p12, %p4098_p2 }
  0x62   : > { %p3863_p6 = pneg %p3862_p0 }
  0x64   : > { %p3868_p11 = pnand %p3866_p7, %p3863_p6 }
  0x66   : > { %3871 = shalt.err (!%p3868_p11)
}
  0x67   : > { %s3872_s17 = scalar_lea.vmem %s4149_s8, 16384  ;;  %p3880_p1 = scmp.lt.s32.totalorder %s4149_s8, %s4149_s8 }
  0x68   : > { %p3873_p13 = scmp.ne.s32.totalorder %s4149_s8, %s3872_s17  ;;  %p3881_p3 = scmp.lt.s32.totalorder %s3872_s17, %s3872_s17 }
  0x6a   : > { %p3875_p5 = pnand %p3873_p13, %p4098_p2  ;;  %p3882_p4 = por %p3881_p3, %p3880_p1 }
  0x6c   : > { %p3876_p10 = pneg %p3875_p5 }
  0x6e   : > { %p3883_p12 = pnand %p3882_p4, %p3876_p10 }
  0x70   : > { %3886 = shalt.err (!%p3883_p12)
}
  0x71   : > { %s3971_s22 = smov 64   ;;  %s3972_s11 = smov 4  }
  0x72   : > { %p4561_p0 = scmp.ne.s32.totalorder %s4556_s19, 0  ;;  %s4562_s23 = sand.u32 1, %s3959_s29  }
  0x73   : > { %s3094_s13 = sshll.u32 %s4562_s23, 9  ;;  %s3317_s24 = sshll.u32 %s3963_s30, 13 }
  0x74   : > { %3579 = dma.hbm_to_vmem [thread:$0]  (!%p4561_p0), %s4536_s4, 16384, %s4149_s8, [#allocation6], %s3971_s22, %s3971_s22, %s3972_s11  }
  0x75   : > { %s4215_s26 = scalar_lea.hbm %s4535_s3, %s3317_s24  ;;  %s314_s18 = scalar_lea.vmem [#allocation8], %s3094_s13 }
  0x76   : > { %s321_s19 = sshll.u32 %s314_s18, 4  ;;  %s3887_s20 = scalar_lea.hbm %s4215_s26, 8192  ;;  %s4217_s19 = int_to_ptr.vmem [resolvable:$true] %s321_s19 }
  0x77   : > { %p3888_p2 = scmp.ne.s32.totalorder %s4215_s26, %s3887_s20  ;;  %s3892_s17 = scalar_lea.hbm %s4535_s3, 16384 }
  0x78   : > { %p3893_p11 = scmp.lt.u32.totalorder %s4215_s26, %s4535_s3  ;;  %p3894_p13 = scmp.lt.u32.totalorder %s3892_s17, %s3887_s20 }
  0x79   : > { %p3890_p6 = pnand %p3888_p2, %p3831_p9  ;;  %p3896_p10 = scmp.lt.u32.totalorder %s3887_s20, %s4215_s26 }
  0x7a   : > { %p3895_p5 = por %p3894_p13, %p3893_p11 }
  0x7b   : > { %p3891_p7 = pneg %p3890_p6 }
  0x7c   : > { %p3897_p1 = por %p3896_p10, %p3895_p5 }
  0x7e   : > { %p3898_p3 = pnand %p3897_p1, %p3891_p7 }
  0x80   : > { %3901 = shalt.err (!%p3898_p3)
}
  0x81   : > { %s3902_s27 = scalar_lea.vmem %s4217_s19, 8192  ;;  %s3973_s23 = smov [#allocation8]  }
  0x82   : > { %p3903_p4 = scmp.ne.s32.totalorder %s4217_s19, %s3902_s27  ;;  %s3907_s13 = sshll.u32 %s3973_s23, 4  ;;  %s3908_s13 = int_to_ptr.vmem [resolvable:$false] %s3907_s13 }
  0x83   : > { %s3909_s24 = scalar_lea.vmem %s3908_s13, 16384  ;;  %p3910_p2 = scmp.lt.s32.totalorder %s4217_s19, %s3908_s13 }
  0x84   : > { %p3905_p12 = pnand %p3903_p4, %p3831_p9  ;;  %p3911_p6 = scmp.lt.s32.totalorder %s3909_s24, %s3902_s27 }
  0x86   : > { %p3906_p0 = pneg %p3905_p12  ;;  %p3912_p11 = por %p3911_p6, %p3910_p2 }
  0x88   : > { %p3913_p13 = pnand %p3912_p11, %p3906_p0 }
  0x8a   : > { %3916 = shalt.err (!%p3913_p13)
}
  0x8b   : > { %s3974_s25 = smov 1024   ;;  %p4563_p9 = scmp.ne.s32.totalorder %s4555_s16, 0 }
  0x8c   : > { %3586 = dma.hbm_to_vmem [thread:$0]  (!%p4560_p8), %s4215_s26, 8192, %s4217_s19, %s4153_s10, %s3974_s25, %s3974_s25, %s3971_s22  }
  0x8d   : > { %347 = sbr.rel (%p4563_p9) target bundleno = 2494 (0x9be), region = 52  ;;  %p4564_p7 = scmp.eq.s32.totalorder (!%p4563_p9), %s4041_s9, 0 }
  0x94   : > { %3934 = dma.done.wait (%p4564_p7), [#allocation4], 256   ;;  %p4565_p5 = pmov %p4564_p7 }
  0x96   : > { %3936 = vsyncadd (%p4565_p5), [#allocation4], 4294967040  ;;  %p4566_p10 = pmov %p4565_p5 }
  0x97   : > { %p4567_p1 = pmov %p4565_p5 }
  0x98   : > { %3938 = dma.done.wait (%p4566_p10), [#allocation6], 256  }
  0x99   : > { %3940 = vsyncadd (%p4567_p1), [#allocation6], 4294967040  ;;  %s357_s21 = sand.u32 1, %s4041_s9   ;;  %s359_s10 = sand.u32 1, %s3955_s28  }
  0x9a   : > { %s3100_s22 = sshll.u32 %s359_s10, 6  ;;  %s358_s16 = scalar_lea.sflag [#allocation4], %s357_s21 }
  0x9b   : > { %s4256_s12 = scalar_lea.vmem [#allocation7], %s3100_s22  ;;  %p4568_p8 = scmp.ne.s32.totalorder %s4554_s15, 0 }
  0x9d   : > { %3942 = dma.done.wait (%p4568_p8), %s358_s16, 9216  }
  0x9e   : > { %3944 = vsyncadd (%p4568_p8), %s358_s16, 4294958080  ;;  %s3101_s26 = sshll.u32 %s359_s10, 9  ;;  %p4569_p3 = pmov %p4567_p1 }
  0x9f   : > { %s4262_s18 = scalar_lea.vmem [#allocation8], %s3101_s26 }
  0xa0   : > { %3946 = dma.done.wait (%p4569_p3), [#allocation6], 16384   ;;  %p4570_p4 = pmov %p4567_p1 }
  0xa1   : > { %p415_p12 = scmp.lt.s32.totalorder %s4041_s9, 1  ;;  %v3106_v0 = vld [vmem:[%s4539_s7] ss:$0 sm:$0xff]  ;;  %v4286_v1 = vld [vmem:[%s4539_s7 + $0x1] ss:$0 sm:$0xff]  ;;  %p4571_p0 = scmp.ne.s32.totalorder %s4041_s9, 0 }
  0xa2   : > { %3948 = vsyncadd (%p4570_p4), [#allocation6], 4294950912  ;;  %v4291_v2 = vld [vmem:[%s4539_s7 + $0x2] ss:$0 sm:$0xff]  ;;  %v434_v4 = vld [vmem:[#allocation5 + $0x8] sm:$0xff] (!%p4571_p0)  ;;  %vm439_vm0 = vcmask (!%p4571_p0), 130048  }
  0xa3   : > { %s416_s19 = scalar_select %p415_p12, %s4041_s9, 1 }
  0xa4   : > { %430 = sbr.rel (%p4571_p0) target bundleno = 389 (0x185), region = 76  ;;  %v433_v3 = vld [vmem:[#allocation5] sm:$0xff] (!%p4571_p0)  ;;  %v431_v5 = vld [vmem:[#allocation3] sm:$0xff] (!%p4571_p0)  ;;  %v432_v7 = vld [vmem:[#allocation3 + $0x8] sm:$0xff] (!%p4571_p0)  ;;  %vm523_vm1 = vcmask (!%p4571_p0), 523264  }
  0xa5   : > { %s3103_s20 = sshll.u32 %s416_s19, 4  ;;  %s3104_s30 = sshll.u32 %s416_s19, 3  ;;  %v3534_v6 = vpack.c.bf16 (!%p4571_p0), %v434_v4, %v433_v3  ;;  %3512 = vmatprep.mubr.msk.f32.mxu0 (!%p4571_p0), %vm439_vm0, %v431_v5 }
  0xa6   : > { %s4273_s15 = scalar_lea.vmem %s4537_s5, %s3103_s20  ;;  %s4278_s27 = scalar_lea.vmem %s4538_s6, %s3104_s30 }
  0xa7   : > { %3535 = vmatprep.subr.bf16.mxu0 (!%p4571_p0), %v3534_v6 }
  0xa8   : > { %3537 = vmatpush3.bf16.msra.mxu0 (!%p4571_p0), %v3534_v6 }
  0xab   : > { %3513 = vmatmul.mubr.msk.f32.vlgmr.msra.gmra.mrb[0].mxu0 %vm439_vm0, %v432_v7 }
 0x17e   : > { %v3514_v8 = vpop.f32.mrb[0].mxu0 }
 0x17f   : > { %v518_v9 = vadd.f32 %v3514_v8, %v3106_v0  ;;  %v512_v10 = vpop.f32.mrb[1].mxu0 }
 0x180   : > { %v513_v11 = vadd.f32 %v3106_v0, %v512_v10 }
 0x181   : > { %v522_v12 = vmax.f32 %v518_v9, 0.0 }
 0x182   : > { %v521_v13 = vmax.f32 %v513_v11, 0.0 }
 0x183   : > { %525 = vst.msk [vmem:[#allocation2 + $0x8] sm:$0xff] %vm523_vm1, %v522_v12 }
 0x184   : > { %524 = vst.msk [vmem:[#allocation2] sm:$0xff] %vm523_vm1, %v521_v13 }
 0x185 PF: > { %v529_v14 = vld [vmem:[%s4256_s12] sm:$0xff]  ;;  %v530_v15 = vld [vmem:[%s4256_s12 + $0x8] sm:$0xff]  ;;  %v531_v16 = vld [vmem:[%s4256_s12 + $0x10] sm:$0xff]  ;;  %vm541_vm2 = vcmask 523264   ;;  %v537_v28 = vlaneseq  ;;  %s3976_s22 = smov 64   ;;  %p4572_p2 = scmp.eq.s32.totalorder %s4041_s9, 0 }
 0x186   : > { %v3538_v17 = vpack.c.bf16 %v530_v15, %v529_v14  ;;  %v532_v18 = vld [vmem:[%s4256_s12 + $0x18] sm:$0xff]  ;;  %v533_v20 = vld [vmem:[%s4256_s12 + $0x20] sm:$0xff]  ;;  %v534_v21 = vld [vmem:[%s4256_s12 + $0x28] sm:$0xff]  ;;  %p3311_p6 = scmp.ne.s32.totalorder %s4041_s9, 1 }
 0x187   : > { %v3542_v19 = vpack.c.bf16 %v532_v18, %v531_v16  ;;  %v535_v23 = vld [vmem:[%s4256_s12 + $0x30] sm:$0xff]  ;;  %v536_v24 = vld [vmem:[%s4256_s12 + $0x38] sm:$0xff]  ;;  %v3546_v25 = vpack.c.bf16 %v534_v21, %v533_v20  ;;  %v4305_v29 = vshrl.u32 %v537_v28, 7  ;;  %v665_v51 = vld [vmem:[%s4262_s18] sm:$0xff]  ;;  %s2888_s16 = scalar_select %p4572_p2, 1, 0 }
 0x188   : > { %3539 = vmatprep.subr.bf16.mxu0 %v3538_v17  ;;  %v3550_v26 = vpack.c.bf16 %v536_v24, %v535_v23  ;;  %v4311_v31 = vld [vmem:[%s4278_s27] sm:$0x3f]  ;;  %v667_v52 = vld [vmem:[%s4262_s18 + $0x40] sm:$0xff]  ;;  %v666_v53 = vld [vmem:[%s4262_s18 + $0x8] sm:$0xff]  ;;  %vm2971_vm4 = vcmask (!%p3311_p6), 7168  }
 0x189   : > { %3541 = vmatpush3.bf16.msra.mxu0 %v3538_v17  ;;  %v4308_v30 = vsub.s32 0, %v4305_v29  ;;  %v3112_v54 = vcombine.high %v665_v51, %v667_v52  ;;  %v668_v55 = vld [vmem:[%s4262_s18 + $0x48] sm:$0xff]  ;;  %v3111_v58 = vcombine.low %v665_v51, %v667_v52  ;;  %v669_v59 = vld [vmem:[%s4262_s18 + $0x80] sm:$0xff]  ;;  %v948_v21 = vld [vmem:[%s4262_s18 + $0x10] sm:$0xff] }
 0x18a   : > { %3543 = vmatprep.subr.bf16.mxu0 %v3542_v19  ;;  %v528_v27 = vld [vmem:[#allocation2 + $0x8] sm:$0xff]  ;;  %v3113_v56 = vcombine.low %v666_v53, %v668_v55  ;;  %v3114_v57 = vcombine.high %v666_v53, %v668_v55  ;;  %v671_v60 = vld [vmem:[%s4262_s18 + $0xc0] sm:$0xff]  ;;  %v670_v61 = vld [vmem:[%s4262_s18 + $0x88] sm:$0xff] }
 0x18b   : > { %v527_v22 = vld [vmem:[#allocation2] sm:$0xff]  ;;  %v540_v32 = vrot.slane %v4311_v31, %v4308_v30  ;;  %850 = vmatprep.subr.bf16.mxu1 %v3112_v54  ;;  %v3116_v62 = vcombine.high %v669_v59, %v671_v60  ;;  %v672_v63 = vld [vmem:[%s4262_s18 + $0xc8] sm:$0xff]  ;;  %v3115_v4 = vcombine.low %v669_v59, %v671_v60  ;;  %v673_v5 = vld [vmem:[%s4262_s18 + $0x100] sm:$0xff] }
 0x18c   : > { %3531 = vmatprep.mubr.msk.f32.mxu0 %vm541_vm2, %v527_v22  ;;  %851 = vmatpush1.bf16.msra.mxu1 %v3111_v58  ;;  %v3117_v0 = vcombine.low %v670_v61, %v672_v63  ;;  %v3118_v3 = vcombine.high %v670_v61, %v672_v63  ;;  %v675_v6 = vld [vmem:[%s4262_s18 + $0x140] sm:$0xff]  ;;  %v674_v7 = vld [vmem:[%s4262_s18 + $0x108] sm:$0xff]  ;;  %v949_v23 = vld [vmem:[%s4262_s18 + $0x18] sm:$0xff] }
 0x18d   : > { %3545 = vmatpush3.bf16.msra.mxu0 %v3542_v19  ;;  %852 = vmatprep.subr.bf16.mxu1 %v3116_v62  ;;  %v3120_v8 = vcombine.high %v673_v5, %v675_v6  ;;  %v676_v9 = vld [vmem:[%s4262_s18 + $0x148] sm:$0xff]  ;;  %v3119_v12 = vcombine.low %v673_v5, %v675_v6  ;;  %v677_v13 = vld [vmem:[%s4262_s18 + $0x180] sm:$0xff]  ;;  %v952_v51 = vld [vmem:[%s4262_s18 + $0x90] sm:$0xff] }
 0x18e   : > { %3547 = vmatprep.subr.bf16.mxu0 %v3546_v25  ;;  %v3121_v10 = vcombine.low %v674_v7, %v676_v9  ;;  %v3122_v11 = vcombine.high %v674_v7, %v676_v9  ;;  %v679_v14 = vld [vmem:[%s4262_s18 + $0x1c0] sm:$0xff]  ;;  %v678_v15 = vld [vmem:[%s4262_s18 + $0x188] sm:$0xff]  ;;  %v954_v52 = vld [vmem:[%s4262_s18 + $0xd0] sm:$0xff] }
 0x18f   : > { %v3124_v16 = vcombine.high %v677_v13, %v679_v14  ;;  %v680_v17 = vld [vmem:[%s4262_s18 + $0x1c8] sm:$0xff]  ;;  %v3123_v20 = vcombine.low %v677_v13, %v679_v14  ;;  %v953_v53 = vld [vmem:[%s4262_s18 + $0x98] sm:$0xff]  ;;  %v956_v58 = vld [vmem:[%s4262_s18 + $0x110] sm:$0xff]  ;;  %v3133_v61 = vcombine.low %v952_v51, %v954_v52 }
 0x190   : > { %853 = vmatpush1.bf16.msra.mxu1 %v3115_v4  ;;  %v3125_v18 = vcombine.low %v678_v15, %v680_v17  ;;  %v3126_v19 = vcombine.high %v678_v15, %v680_v17  ;;  %v955_v54 = vld [vmem:[%s4262_s18 + $0xd8] sm:$0xff]  ;;  %v962_v4 = vld [vmem:[%s4262_s18 + $0x1d0] sm:$0xff]  ;;  %v3636_v13 = vld [vmem:[#allocation9 + $0x140] sm:$0xff]  }
 0x191   : > { %3549 = vmatpush3.bf16.msra.mxu0 %v3546_v25  ;;  %854 = vmatprep.subr.bf16.mxu1 %v3120_v8  ;;  %v951_v25 = vld [vmem:[%s4262_s18 + $0x58] sm:$0xff]  ;;  %v3135_v62 = vcombine.low %v953_v53, %v955_v54  ;;  %v3637_v14 = vld [vmem:[#allocation9 + $0x1c0] sm:$0xff]   ;;  %v3640_v17 = vld [vmem:[#allocation9 + $0x148] sm:$0xff]  }
 0x192   : > { %3551 = vmatprep.subr.bf16.mxu0 %v3550_v26  ;;  %v3132_v28 = vcombine.high %v949_v23, %v951_v25  ;;  %v957_v59 = vld [vmem:[%s4262_s18 + $0x118] sm:$0xff]  ;;  %v3638_v15 = vld [vmem:[#allocation9 + $0x100] sm:$0xff]  }
 0x193   : > { %v959_v60 = vld [vmem:[%s4262_s18 + $0x158] sm:$0xff] }
 0x194   : > { %855 = vmatpush1.bf16.msra.mxu1 %v3119_v12  ;;  %v961_v5 = vld [vmem:[%s4262_s18 + $0x198] sm:$0xff]  ;;  %v3139_v8 = vcombine.low %v957_v59, %v959_v60 }
 0x195   : > { %3553 = vmatpush3.bf16.msra.mxu0 %v3550_v26  ;;  %856 = vmatprep.subr.bf16.mxu1 %v3124_v16  ;;  %v963_v6 = vld [vmem:[%s4262_s18 + $0x1d8] sm:$0xff]  ;;  %v3639_v16 = vld [vmem:[#allocation9 + $0x180] sm:$0xff]  }
 0x196   : > { %893 = vmatprep.subr.bf16.mxu0 %v3114_v57  ;;  %v3134_v57 = vcombine.high %v952_v51, %v954_v52  ;;  %v3143_v12 = vcombine.low %v961_v5, %v963_v6  ;;  %v3666_v51 = vld [vmem:[#allocation9 + $0x138] sm:$0xff]  }
 0x197   : > { %v3667_v52 = vld [vmem:[#allocation9 + $0x1b8] sm:$0xff]  }
 0x198   : > { %3532 = vmatmul.mubr.msk.f32.vlgmr.msra.gmra.mrb[0].mxu0 %vm541_vm2, %v528_v27  ;;  %857 = vmatpush1.bf16.msra.mxu1 %v3123_v20  ;;  %v3643_v20 = vld [vmem:[#allocation9 + $0x188] sm:$0xff]  }
 0x199   : > { %894 = vmatpush1.bf16.msra.mxu0 %v3113_v56 }
 0x19a   : > { %895 = vmatprep.subr.bf16.mxu0 %v3118_v3  ;;  %v960_v3 = vld [vmem:[%s4262_s18 + $0x190] sm:$0xff] }
 0x19b   : > { %v3142_v9 = vcombine.high %v960_v3, %v962_v4 }
 0x19d   : > { %896 = vmatpush1.bf16.msra.mxu0 %v3117_v0  ;;  %v3140_v0 = vcombine.high %v957_v59, %v959_v60 }
 0x19e   : > { %897 = vmatprep.subr.bf16.mxu0 %v3122_v11  ;;  %v3141_v11 = vcombine.low %v960_v3, %v962_v4 }
 0x1a1   : > { %898 = vmatpush1.bf16.msra.mxu0 %v3121_v10  ;;  %v3144_v10 = vcombine.high %v961_v5, %v963_v6 }
 0x1a2   : > { %899 = vmatprep.subr.bf16.mxu0 %v3126_v19  ;;  %v3642_v19 = vld [vmem:[#allocation9 + $0x108] sm:$0xff]  }
 0x1a5   : > { %900 = vmatpush1.bf16.msra.mxu0 %v3125_v18  ;;  %v3641_v18 = vld [vmem:[#allocation9 + $0x1c8] sm:$0xff]  }
 0x1a6   : > { %1173 = vmatprep.subr.bf16.mxu0 %v3132_v28  ;;  %v3651_v28 = vld [vmem:[#allocation9 + $0x198] sm:$0xff]  }
 0x26b   : > { %v3533_v33 = vpop.f32.mrb[0].mxu0 }
 0x26c   : > { %v614_v34 = vpop.f32.mrb[1].mxu0  ;;  %v620_v35 = vadd.f32 %v3533_v33, %v540_v32 }
 0x26d   : > { %v615_v36 = vadd.f32 %v614_v34, %v540_v32  ;;  %v3975_v32 = vmov 0  }
 0x26e   : > { %v624_v39 = vadd.f32 %v620_v35, %v528_v27  ;;  %v3131_v27 = vcombine.low %v949_v23, %v951_v25  ;;  %882 = vmatprep.mubr.bf16.mxu1 %v3975_v32  ;;  %925 = vmatprep.mubr.bf16.mxu0 %v3975_v32  ;;  %v3646_v23 = vld [vmem:[#allocation9 + $0x110] sm:$0xff]   ;;  %v3648_v25 = vld [vmem:[#allocation9 + $0x158] sm:$0xff]  }
 0x26f   : > { %v623_v37 = vadd.f32 %v615_v36, %v527_v22  ;;  %v950_v22 = vld [vmem:[%s4262_s18 + $0x50] sm:$0xff] }
 0x270   : > { %v628_v40 = vsel %vm541_vm2, %v624_v39, 0.0  ;;  %v3130_v24 = vcombine.high %v948_v21, %v950_v22  ;;  %v3129_v26 = vcombine.low %v948_v21, %v950_v22  ;;  %v3644_v21 = vld [vmem:[#allocation9 + $0x150] sm:$0xff]  }
 0x271   : > { %v625_v38 = vsel %vm541_vm2, %v623_v37, 0.0  ;;  %v3645_v22 = vld [vmem:[#allocation9 + $0x1d0] sm:$0xff]  }
 0x272   : > { %626 = vadd.xlane.f32.xlu0 %v625_v38  ;;  %1130 = vmatprep.subr.bf16.mxu1 %v3130_v24  ;;  %v3647_v24 = vld [vmem:[#allocation9 + $0x190] sm:$0xff]  }
 0x276   : > { %629 = vadd.xlane.f32.xlu0 %v628_v40 }
 0x2ff   : > { %v627_v41 = vpop.xlane.xlu0 %626 }
 0x300   : > { %v632_v42 = vmul.f32 0.015625, %v627_v41 }
 0x302   : > { %v4317_v43 = vsub.f32 %v623_v37, %v632_v42  ;;  %v4355_v42 = vsub.s32 2, %v4305_v29 }
 0x303   : > { %v630_v44 = vpop.xlane.xlu0 %629 }
 0x304   : > { %v633_v45 = vmul.f32 0.015625, %v630_v44  ;;  %v636_v46 = vmul.f32 %v4317_v43, %v4317_v43 }
 0x306   : > { %v4321_v47 = vsub.f32 %v624_v39, %v633_v45  ;;  %v638_v48 = vsel %vm541_vm2, %v636_v46, 0.0  ;;  %v4350_v39 = vsub.s32 1, %v4305_v29  ;;  %v661_v46 = vrot.slane %v4311_v31, %v4355_v42 }
 0x307   : > { %639 = vadd.xlane.f32.xlu1 %v638_v48 }
 0x308   : > { %v637_v49 = vmul.f32 %v4321_v47, %v4321_v47  ;;  %v655_v41 = vrot.slane %v4311_v31, %v4350_v39  ;;  %v3136_v31 = vcombine.high %v953_v53, %v955_v54  ;;  %v3668_v53 = vld [vmem:[#allocation9 + $0x40] sm:$0xff]  }
 0x309   : > { %v3669_v54 = vld [vmem:[#allocation9 + $0xc0] sm:$0xff]  }
 0x30a   : > { %v641_v50 = vsel %vm541_vm2, %v637_v49, 0.0 }
 0x30b   : > { %642 = vadd.xlane.f32.xlu1 %v641_v50 }
 0x394   : > { %v640_v33 = vpop.xlane.xlu1 %639 }
 0x395   : > { %v644_v34 = vmul.f32 0.015625, %v640_v33  ;;  %v3652_v33 = vld [vmem:[#allocation9 + $0x160] sm:$0xff]  }
 0x397   : > { %v646_v35 = vadd.f32 1e-05, %v644_v34  ;;  %v3653_v34 = vld [vmem:[#allocation9 + $0x1e0] sm:$0xff]  }
 0x398   : > { %v643_v36 = vpop.xlane.xlu1 %642 }
 0x399   : > { %3764 = vrsqrt.f32 %v646_v35  ;;  %v645_v37 = vmul.f32 0.015625, %v643_v36  ;;  %v3654_v35 = vld [vmem:[#allocation9 + $0x120] sm:$0xff]  }
 0x39a   : > { %v3655_v36 = vld [vmem:[#allocation9 + $0x1a0] sm:$0xff]  }
 0x39b   : > { %v647_v38 = vadd.f32 1e-05, %v645_v37  ;;  %v3656_v37 = vld [vmem:[#allocation9 + $0x168] sm:$0xff]  }
 0x39d   : > { %3766 = vrsqrt.f32 %v647_v38  ;;  %v3657_v38 = vld [vmem:[#allocation9 + $0x1e8] sm:$0xff]  }
 0x3a3   : > { %v3765_v40 = vpop.eup %3764 }
 0x3a4   : > { %v650_v44 = vmul.f32 %v3765_v40, %v4317_v43  ;;  %v3658_v40 = vld [vmem:[#allocation9 + $0x128] sm:$0xff]  }
 0x3a6   : > { %v656_v48 = vmul.f32 %v655_v41, %v650_v44  ;;  %v3660_v44 = vld [vmem:[#allocation9 + $0x170] sm:$0xff]  }
 0x3a7   : > { %v3767_v45 = vpop.eup %3766 }
 0x3a8   : > { %v651_v49 = vmul.f32 %v3767_v45, %v4321_v47  ;;  %v4365_v55 = vadd.f32 %v661_v46, %v656_v48  ;;  %v958_v47 = vld [vmem:[%s4262_s18 + $0x150] sm:$0xff] }
 0x3a9   : > { %v3138_v63 = vcombine.high %v956_v58, %v958_v47  ;;  %v3137_v7 = vcombine.low %v956_v58, %v958_v47  ;;  %v3661_v45 = vld [vmem:[#allocation9 + $0x1f0] sm:$0xff]  }
 0x3aa   : > { %v657_v50 = vmul.f32 %v655_v41, %v651_v49  ;;  %v3659_v41 = vld [vmem:[#allocation9 + $0x1a8] sm:$0xff]   ;;  %v3663_v48 = vld [vmem:[#allocation9 + $0x1b0] sm:$0xff]   ;;  %v3664_v49 = vld [vmem:[#allocation9 + $0x178] sm:$0xff]  }
 0x3ac   : > { %v4367_v56 = vadd.f32 %v661_v46, %v657_v50  ;;  %v3662_v46 = vld [vmem:[#allocation9 + $0x130] sm:$0xff]   ;;  %v3665_v50 = vld [vmem:[#allocation9 + $0x1f8] sm:$0xff]  }
 0x3ae   : > { %v4371_v43 = vpack.c.bf16 %v4367_v56, %v4365_v55 }
 0x3b0   : > { %3127 = vmatmul.mubr.msk.bf16.vlgmr.msra.gmra.mrb[0].mxu1 %vm541_vm2, %v4371_v43  ;;  %3128 = vmatmul.mubr.msk.bf16.vlgmr.msra.gmra.mrb[4].mxu0 %vm541_vm2, %v4371_v43 }
 0x3b1   : > { %1131 = vmatpush1.bf16.msra.mxu1 %v3129_v26  ;;  %1174 = vmatpush1.bf16.msra.mxu0 %v3131_v27  ;;  %v3649_v26 = vld [vmem:[#allocation9 + $0x1d8] sm:$0xff]  }
 0x3b2   : > { %1132 = vmatprep.subr.bf16.mxu1 %v3134_v57  ;;  %1175 = vmatprep.subr.bf16.mxu0 %v3136_v31  ;;  %v3650_v27 = vld [vmem:[#allocation9 + $0x118] sm:$0xff]   ;;  %v681_v57 = vld [vmem:[%s4273_s15] sm:$0xf]  ;;  %v4393_v31 = vsub.s32 3, %v4305_v29 }
 0x3b3   : > { %1162 = vmatprep.mubr.bf16.mxu1 %v3975_v32  ;;  %1205 = vmatprep.mubr.bf16.mxu0 %v3975_v32  ;;  %v750_v58 = vrot.slane %v681_v57, %v4308_v30  ;;  %v758_v47 = vrot.slane %v681_v57, %v4355_v42  ;;  %v754_v59 = vrot.slane %v681_v57, %v4350_v39 }
 0x3b4   : > { %v762_v60 = vrot.slane %v681_v57, %v4393_v31 }
 0x3b5   : > { %1133 = vmatpush1.bf16.msra.mxu1 %v3133_v61  ;;  %1176 = vmatpush1.bf16.msra.mxu0 %v3135_v62 }
 0x3b6   : > { %1134 = vmatprep.subr.bf16.mxu1 %v3138_v63  ;;  %1177 = vmatprep.subr.bf16.mxu0 %v3140_v0 }
 0x3b9   : > { %1135 = vmatpush1.bf16.msra.mxu1 %v3137_v7  ;;  %1178 = vmatpush1.bf16.msra.mxu0 %v3139_v8 }
 0x3ba   : > { %1136 = vmatprep.subr.bf16.mxu1 %v3142_v9  ;;  %1179 = vmatprep.subr.bf16.mxu0 %v3144_v10 }
 0x3bd   : > { %1137 = vmatpush1.bf16.msra.mxu1 %v3141_v11  ;;  %1180 = vmatpush1.bf16.msra.mxu0 %v3143_v12 }
 0x3be   : > { %3332 = vmatprep.subr.bf16.mxu1 %v3636_v13  ;;  %3354 = vmatprep.subr.bf16.mxu0 %v3637_v14 }
 0x3c0   : > { %3145 = vmatmul.mubr.msk.bf16.vlgmr.msra.gmra.mrb[4].mxu1 %vm541_vm2, %v4371_v43  ;;  %3146 = vmatmul.mubr.msk.bf16.vlgmr.msra.gmra.mrb[8].mxu0 %vm541_vm2, %v4371_v43 }
 0x3c1   : > { %3333 = vmatpush3.bf16.msra.mxu1 %v3638_v15  ;;  %3355 = vmatpush3.bf16.msra.mxu0 %v3639_v16 }
 0x3c2   : > { %3334 = vmatprep.subr.bf16.mxu1 %v3640_v17  ;;  %3356 = vmatprep.subr.bf16.mxu0 %v3641_v18 }
 0x3c5   : > { %3335 = vmatpush3.bf16.msra.mxu1 %v3642_v19  ;;  %3357 = vmatpush3.bf16.msra.mxu0 %v3643_v20 }
 0x3c6   : > { %3336 = vmatprep.subr.bf16.mxu1 %v3644_v21  ;;  %3358 = vmatprep.subr.bf16.mxu0 %v3645_v22 }
 0x3c9   : > { %3337 = vmatpush3.bf16.msra.mxu1 %v3646_v23  ;;  %3359 = vmatpush3.bf16.msra.mxu0 %v3647_v24 }
 0x3ca   : > { %3338 = vmatprep.subr.bf16.mxu1 %v3648_v25  ;;  %3360 = vmatprep.subr.bf16.mxu0 %v3649_v26 }
 0x3cd   : > { %3339 = vmatpush3.bf16.msra.mxu1 %v3650_v27  ;;  %3361 = vmatpush3.bf16.msra.mxu0 %v3651_v28  ;;  %v964_v27 = vld [vmem:[%s4273_s15 + $0x4] sm:$0xf] }
 0x3ce   : > { %3340 = vmatprep.subr.bf16.mxu1 %v3652_v33  ;;  %3362 = vmatprep.subr.bf16.mxu0 %v3653_v34  ;;  %v1033_v28 = vrot.slane %v964_v27, %v4308_v30  ;;  %v1041_v33 = vrot.slane %v964_v27, %v4355_v42  ;;  %v1037_v34 = vrot.slane %v964_v27, %v4350_v39 }
 0x3d1   : > { %3341 = vmatpush3.bf16.msra.mxu1 %v3654_v35  ;;  %3363 = vmatpush3.bf16.msra.mxu0 %v3655_v36  ;;  %v1045_v35 = vrot.slane %v964_v27, %v4393_v31  ;;  %v3688_v27 = vld [vmem:[#allocation9 + $0x68] sm:$0xff]  }
 0x3d2   : > { %3342 = vmatprep.subr.bf16.mxu1 %v3656_v37  ;;  %3364 = vmatprep.subr.bf16.mxu0 %v3657_v38 }
 0x3d5   : > { %3343 = vmatpush3.bf16.msra.mxu1 %v3658_v40  ;;  %3365 = vmatpush3.bf16.msra.mxu0 %v3659_v41 }
 0x3d6   : > { %3344 = vmatprep.subr.bf16.mxu1 %v3660_v44  ;;  %3366 = vmatprep.subr.bf16.mxu0 %v3661_v45 }
 0x3d9   : > { %3345 = vmatpush3.bf16.msra.mxu1 %v3662_v46  ;;  %3367 = vmatpush3.bf16.msra.mxu0 %v3663_v48 }
 0x3da   : > { %3346 = vmatprep.subr.bf16.mxu1 %v3664_v49  ;;  %3368 = vmatprep.subr.bf16.mxu0 %v3665_v50 }
 0x3dd   : > { %3347 = vmatpush3.bf16.msra.mxu1 %v3666_v51  ;;  %3369 = vmatpush3.bf16.msra.mxu0 %v3667_v52 }
 0x3de   : > { %3376 = vmatprep.subr.bf16.mxu1 %v3668_v53  ;;  %3398 = vmatprep.subr.bf16.mxu0 %v3669_v54 }
 0x483   : > { %v884_v61 = vpop.f32.mrb[0].mxu1  ;;  %v927_v62 = vpop.f32.mrb[4].mxu0 }
 0x484   : > { %v885_v63 = vadd.f32 %v884_v61, %v750_v58  ;;  %v928_v0 = vadd.f32 %v927_v62, %v758_v47  ;;  %v886_v3 = vpop.f32.mrb[1].mxu1  ;;  %v929_v4 = vpop.f32.mrb[5].mxu0 }
 0x485   : > { %v887_v5 = vadd.f32 %v886_v3, %v754_v59  ;;  %v930_v6 = vadd.f32 %v929_v4, %v762_v60  ;;  %v888_v7 = vpop.f32.mrb[2].mxu1  ;;  %v931_v8 = vpop.f32.mrb[6].mxu0 }
 0x486   : > { %v889_v9 = vadd.f32 %v888_v7, %v750_v58  ;;  %v932_v10 = vadd.f32 %v931_v8, %v758_v47  ;;  %v890_v11 = vpop.f32.mrb[3].mxu1  ;;  %v933_v12 = vpop.f32.mrb[7].mxu0  ;;  %v936_v15 = vmax.f32 %v885_v63, 0.0  ;;  %v938_v16 = vmax.f32 %v928_v0, 0.0  ;;  %v3670_v7 = vld [vmem:[#allocation9] sm:$0xff]  }
 0x487   : > { %v891_v13 = vadd.f32 %v890_v11, %v754_v59  ;;  %v934_v14 = vadd.f32 %v933_v12, %v762_v60  ;;  %v937_v19 = vmax.f32 %v887_v5, 0.0  ;;  %v939_v20 = vmax.f32 %v930_v6, 0.0  ;;  %v3671_v8 = vld [vmem:[#allocation9 + $0x80] sm:$0xff]   ;;  %v3674_v11 = vld [vmem:[#allocation9 + $0x8] sm:$0xff]  }
 0x488   : > { %v940_v17 = vmax.f32 %v889_v9, 0.0  ;;  %v942_v18 = vmax.f32 %v932_v10, 0.0  ;;  %v3672_v9 = vld [vmem:[#allocation9 + $0x48] sm:$0xff]  }
 0x489   : > { %v941_v21 = vmax.f32 %v891_v13, 0.0  ;;  %v943_v22 = vmax.f32 %v934_v14, 0.0  ;;  %v3673_v10 = vld [vmem:[#allocation9 + $0xc8] sm:$0xff]   ;;  %v3676_v13 = vld [vmem:[#allocation9 + $0x50] sm:$0xff]  }
 0x48a   : > { %v4399_v23 = vpack.c.bf16 %v940_v17, %v936_v15  ;;  %v4401_v24 = vpack.c.bf16 %v942_v18, %v938_v16  ;;  %v3675_v12 = vld [vmem:[#allocation9 + $0x88] sm:$0xff]   ;;  %v3677_v14 = vld [vmem:[#allocation9 + $0xd0] sm:$0xff]   ;;  %v3680_v17 = vld [vmem:[#allocation9 + $0x58] sm:$0xff]  }
 0x48b   : > { %v945_v25 = vpack.c.bf16 %v941_v21, %v937_v19  ;;  %v947_v26 = vpack.c.bf16 %v943_v22, %v939_v20  ;;  %v3678_v15 = vld [vmem:[#allocation9 + $0x10] sm:$0xff]   ;;  %v3681_v18 = vld [vmem:[#allocation9 + $0xd8] sm:$0xff]   ;;  %v3684_v21 = vld [vmem:[#allocation9 + $0x60] sm:$0xff]  }
 0x48c   : > { %v3679_v16 = vld [vmem:[#allocation9 + $0x90] sm:$0xff]   ;;  %v3682_v19 = vld [vmem:[#allocation9 + $0x18] sm:$0xff]   ;;  %v3685_v22 = vld [vmem:[#allocation9 + $0xe0] sm:$0xff]  }
 0x48d   : > { %v3683_v20 = vld [vmem:[#allocation9 + $0x98] sm:$0xff]  }
 0x493   : > { %v1164_v36 = vpop.f32.mrb[4].mxu1  ;;  %v1207_v37 = vpop.f32.mrb[8].mxu0 }
 0x494   : > { %v1165_v38 = vadd.f32 %v1164_v36, %v1033_v28  ;;  %v1208_v40 = vadd.f32 %v1207_v37, %v1041_v33  ;;  %v1166_v41 = vpop.f32.mrb[5].mxu1  ;;  %v1209_v44 = vpop.f32.mrb[9].mxu0  ;;  %v3693_v36 = vld [vmem:[#allocation9 + $0xf0] sm:$0xff]  }
 0x495   : > { %v1167_v45 = vadd.f32 %v1166_v41, %v1037_v34  ;;  %v1210_v46 = vadd.f32 %v1209_v44, %v1045_v35  ;;  %v1168_v48 = vpop.f32.mrb[6].mxu1  ;;  %v1211_v49 = vpop.f32.mrb[10].mxu0  ;;  %v3694_v37 = vld [vmem:[#allocation9 + $0x30] sm:$0xff]   ;;  %v3697_v41 = vld [vmem:[#allocation9 + $0xf8] sm:$0xff]   ;;  %v1776_v44 = vld [vmem:[%s4262_s18 + $0x20] sm:$0xff] }
 0x496   : > { %v1169_v50 = vadd.f32 %v1168_v48, %v1033_v28  ;;  %v1212_v51 = vadd.f32 %v1211_v49, %v1041_v33  ;;  %v1170_v52 = vpop.f32.mrb[7].mxu1  ;;  %v1213_v53 = vpop.f32.mrb[11].mxu0  ;;  %v1216_v58 = vmax.f32 %v1165_v38, 0.0  ;;  %v1218_v47 = vmax.f32 %v1208_v40, 0.0  ;;  %v3689_v28 = vld [vmem:[#allocation9 + $0xe8] sm:$0xff]   ;;  %v3695_v38 = vld [vmem:[#allocation9 + $0xb0] sm:$0xff]  }
 0x497   : > { %v1171_v54 = vadd.f32 %v1170_v52, %v1037_v34  ;;  %v1214_v57 = vadd.f32 %v1213_v53, %v1045_v35  ;;  %v1217_v61 = vmax.f32 %v1167_v45, 0.0  ;;  %v1219_v62 = vmax.f32 %v1210_v46, 0.0  ;;  %v3690_v33 = vld [vmem:[#allocation9 + $0x28] sm:$0xff]   ;;  %v3692_v35 = vld [vmem:[#allocation9 + $0x70] sm:$0xff]   ;;  %v3696_v40 = vld [vmem:[#allocation9 + $0x78] sm:$0xff]  }
 0x498   : > { %v1220_v59 = vmax.f32 %v1169_v50, 0.0  ;;  %v1222_v60 = vmax.f32 %v1212_v51, 0.0  ;;  %v3691_v34 = vld [vmem:[#allocation9 + $0xa8] sm:$0xff]   ;;  %v1778_v45 = vld [vmem:[%s4262_s18 + $0x60] sm:$0xff]  ;;  %v3698_v49 = vld [vmem:[#allocation9 + $0x38] sm:$0xff]  }
 0x499   : > { %v1221_v63 = vmax.f32 %v1171_v54, 0.0  ;;  %v1223_v0 = vmax.f32 %v1214_v57, 0.0  ;;  %v1777_v46 = vld [vmem:[%s4262_s18 + $0x28] sm:$0xff]  ;;  %v3699_v50 = vld [vmem:[#allocation9 + $0xb8] sm:$0xff]   ;;  %v3212_v51 = vcombine.high %v1776_v44, %v1778_v45  ;;  %v1780_v53 = vld [vmem:[%s4262_s18 + $0xa0] sm:$0xff] }
 0x49a   : > { %v1224_v3 = vpack.c.bf16 %v1220_v59, %v1216_v58  ;;  %v1226_v4 = vpack.c.bf16 %v1222_v60, %v1218_v47  ;;  %v1779_v48 = vld [vmem:[%s4262_s18 + $0x68] sm:$0xff]  ;;  %v1782_v54 = vld [vmem:[%s4262_s18 + $0xe0] sm:$0xff]  ;;  %v3211_v47 = vcombine.low %v1776_v44, %v1778_v45 }
 0x49b   : > { %v1225_v5 = vpack.c.bf16 %v1221_v63, %v1217_v61  ;;  %v1227_v6 = vpack.c.bf16 %v1223_v0, %v1219_v62  ;;  %v3214_v52 = vcombine.high %v1777_v46, %v1779_v48  ;;  %v1781_v57 = vld [vmem:[%s4262_s18 + $0xa8] sm:$0xff]  ;;  %v3213_v59 = vcombine.low %v1777_v46, %v1779_v48  ;;  %v1784_v62 = vld [vmem:[%s4262_s18 + $0x120] sm:$0xff] }
 0x49c   : > { %v1783_v58 = vld [vmem:[%s4262_s18 + $0xe8] sm:$0xff]  ;;  %v3216_v60 = vcombine.high %v1780_v53, %v1782_v54  ;;  %v1786_v63 = vld [vmem:[%s4262_s18 + $0x160] sm:$0xff] }
 0x49d   : > { %1452 = vmatprep.mubr.bf16.mxu1 %v1225_v5  ;;  %1493 = vmatprep.mubr.bf16.mxu0 %v1227_v6  ;;  %v3218_v61 = vcombine.high %v1781_v57, %v1783_v58  ;;  %v1785_v0 = vld [vmem:[%s4262_s18 + $0x128] sm:$0xff]  ;;  %v3217_v5 = vcombine.low %v1781_v57, %v1783_v58  ;;  %v3220_v6 = vcombine.high %v1784_v62, %v1786_v63  ;;  %v3719_v44 = vld [vmem:[#allocation9 + $0x2a0] sm:$0xff]   ;;  %v3729_v57 = vld [vmem:[#allocation9 + $0x2f8] sm:$0xff]  }
 0x49e   : > { %1453 = vmatmul.mubr.bf16.vlgmr.msra.gmra.mrb[8].mxu1 %v1224_v3  ;;  %1494 = vmatmul.mubr.bf16.vlgmr.msra.gmra.mrb[12].mxu0 %v1226_v4  ;;  %v1787_v3 = vld [vmem:[%s4262_s18 + $0x168] sm:$0xff]  ;;  %v3215_v4 = vcombine.low %v1780_v53, %v1782_v54  ;;  %v3727_v53 = vld [vmem:[#allocation9 + $0x2b0] sm:$0xff]   ;;  %v3728_v54 = vld [vmem:[#allocation9 + $0x278] sm:$0xff]  }
 0x49f   : > { %3377 = vmatpush3.bf16.msra.mxu1 %v3670_v7  ;;  %3399 = vmatpush3.bf16.msra.mxu0 %v3671_v8  ;;  %v3222_v7 = vcombine.high %v1785_v0, %v1787_v3  ;;  %v1788_v8 = vld [vmem:[%s4262_s18 + $0x1a0] sm:$0xff]  ;;  %v3720_v45 = vld [vmem:[#allocation9 + $0x268] sm:$0xff]   ;;  %v3730_v58 = vld [vmem:[#allocation9 + $0x238] sm:$0xff]  }
 0x4a0   : > { %1726 = vmatprep.mubr.bf16.mxu1 %v945_v25  ;;  %1767 = vmatprep.mubr.bf16.mxu0 %v947_v26  ;;  %v3686_v25 = vld [vmem:[#allocation9 + $0x20] sm:$0xff]   ;;  %v3721_v46 = vld [vmem:[#allocation9 + $0x2e8] sm:$0xff]  }
 0x4a1   : > { %3378 = vmatprep.subr.bf16.mxu1 %v3672_v9  ;;  %3400 = vmatprep.subr.bf16.mxu0 %v3673_v10  ;;  %v3687_v26 = vld [vmem:[#allocation9 + $0xa0] sm:$0xff]   ;;  %v1789_v10 = vld [vmem:[%s4262_s18 + $0x1a8] sm:$0xff] }
 0x4a2   : > { %v1790_v9 = vld [vmem:[%s4262_s18 + $0x1e0] sm:$0xff]  ;;  %v3722_v48 = vld [vmem:[#allocation9 + $0x228] sm:$0xff]  }
 0x4a3   : > { %3379 = vmatpush3.bf16.msra.mxu1 %v3674_v11  ;;  %3401 = vmatpush3.bf16.msra.mxu0 %v3675_v12  ;;  %v1791_v11 = vld [vmem:[%s4262_s18 + $0x1e8] sm:$0xff]  ;;  %v3224_v12 = vcombine.high %v1788_v8, %v1790_v9 }
 0x4a4   : > { %3380 = vmatprep.subr.bf16.mxu1 %v3676_v13  ;;  %3402 = vmatprep.subr.bf16.mxu0 %v3677_v14  ;;  %v3226_v13 = vcombine.high %v1789_v10, %v1791_v11  ;;  %v3223_v14 = vcombine.low %v1788_v8, %v1790_v9 }
 0x4a7   : > { %3381 = vmatpush3.bf16.msra.mxu1 %v3678_v15  ;;  %3403 = vmatpush3.bf16.msra.mxu0 %v3679_v16  ;;  %v3225_v15 = vcombine.low %v1789_v10, %v1791_v11  ;;  %v3700_v16 = vld [vmem:[#allocation9 + $0x240] sm:$0xff]  }
 0x4a8   : > { %3382 = vmatprep.subr.bf16.mxu1 %v3680_v17  ;;  %3404 = vmatprep.subr.bf16.mxu0 %v3681_v18  ;;  %v3701_v17 = vld [vmem:[#allocation9 + $0x2c0] sm:$0xff]  }
 0x4a9   : > { %v3702_v18 = vld [vmem:[#allocation9 + $0x200] sm:$0xff]  }
 0x4ab   : > { %3383 = vmatpush3.bf16.msra.mxu1 %v3682_v19  ;;  %3405 = vmatpush3.bf16.msra.mxu0 %v3683_v20  ;;  %v3703_v19 = vld [vmem:[#allocation9 + $0x280] sm:$0xff]   ;;  %v3704_v20 = vld [vmem:[#allocation9 + $0x248] sm:$0xff]  }
 0x4ac   : > { %3384 = vmatprep.subr.bf16.mxu1 %v3684_v21  ;;  %3406 = vmatprep.subr.bf16.mxu0 %v3685_v22  ;;  %v3705_v21 = vld [vmem:[#allocation9 + $0x2c8] sm:$0xff]  }
 0x4ad   : > { %v3706_v22 = vld [vmem:[#allocation9 + $0x208] sm:$0xff]  }
 0x4af   : > { %3385 = vmatpush3.bf16.msra.mxu1 %v3686_v25  ;;  %3407 = vmatpush3.bf16.msra.mxu0 %v3687_v26  ;;  %v3707_v25 = vld [vmem:[#allocation9 + $0x288] sm:$0xff]   ;;  %v3708_v26 = vld [vmem:[#allocation9 + $0x250] sm:$0xff]  }
 0x4b0   : > { %3386 = vmatprep.subr.bf16.mxu1 %v3688_v27  ;;  %3408 = vmatprep.subr.bf16.mxu0 %v3689_v28  ;;  %v3709_v27 = vld [vmem:[#allocation9 + $0x2d0] sm:$0xff]  }
 0x4b1   : > { %v3710_v28 = vld [vmem:[#allocation9 + $0x210] sm:$0xff]  }
 0x4b3   : > { %3387 = vmatpush3.bf16.msra.mxu1 %v3690_v33  ;;  %3409 = vmatpush3.bf16.msra.mxu0 %v3691_v34  ;;  %v3711_v33 = vld [vmem:[#allocation9 + $0x290] sm:$0xff]   ;;  %v3712_v34 = vld [vmem:[#allocation9 + $0x258] sm:$0xff]  }
 0x4b4   : > { %3388 = vmatprep.subr.bf16.mxu1 %v3692_v35  ;;  %3410 = vmatprep.subr.bf16.mxu0 %v3693_v36  ;;  %v3713_v35 = vld [vmem:[#allocation9 + $0x2d8] sm:$0xff]  }
 0x4b5   : > { %v3714_v36 = vld [vmem:[#allocation9 + $0x218] sm:$0xff]  }
 0x4b7   : > { %3389 = vmatpush3.bf16.msra.mxu1 %v3694_v37  ;;  %3411 = vmatpush3.bf16.msra.mxu0 %v3695_v38  ;;  %v3715_v37 = vld [vmem:[#allocation9 + $0x298] sm:$0xff]   ;;  %v3716_v38 = vld [vmem:[#allocation9 + $0x260] sm:$0xff]  }
 0x4b8   : > { %3390 = vmatprep.subr.bf16.mxu1 %v3696_v40  ;;  %3412 = vmatprep.subr.bf16.mxu0 %v3697_v41  ;;  %v3717_v40 = vld [vmem:[#allocation9 + $0x2e0] sm:$0xff]  }
 0x4b9   : > { %v3718_v41 = vld [vmem:[#allocation9 + $0x220] sm:$0xff]  }
 0x4bb   : > { %3391 = vmatpush3.bf16.msra.mxu1 %v3698_v49  ;;  %3413 = vmatpush3.bf16.msra.mxu0 %v3699_v50  ;;  %v3723_v49 = vld [vmem:[#allocation9 + $0x2a8] sm:$0xff]   ;;  %v3724_v50 = vld [vmem:[#allocation9 + $0x270] sm:$0xff]  }
 0x4bc   : > { %1958 = vmatprep.subr.bf16.mxu1 %v3212_v51  ;;  %2001 = vmatprep.subr.bf16.mxu0 %v3214_v52  ;;  %v3725_v51 = vld [vmem:[#allocation9 + $0x2f0] sm:$0xff]  }
 0x4bd   : > { %v3726_v52 = vld [vmem:[#allocation9 + $0x230] sm:$0xff]  }
 0x4be   : > { %1727 = vmatmul.mubr.bf16.vlgmr.msra.gmra.mrb[12].mxu1 %v4399_v23  ;;  %1768 = vmatmul.mubr.bf16.vlgmr.msra.gmra.mrb[16].mxu0 %v4401_v24  ;;  %v3219_v23 = vcombine.low %v1784_v62, %v1786_v63  ;;  %v3221_v24 = vcombine.low %v1785_v0, %v1787_v3  ;;  %v4444_v63 = vld [vmem:[%s4262_s18 + $0x78] sm:$0xff] }
 0x4bf   : > { %1959 = vmatpush1.bf16.msra.mxu1 %v3211_v47  ;;  %2002 = vmatpush1.bf16.msra.mxu0 %v3213_v59  ;;  %v3731_v47 = vld [vmem:[#allocation9 + $0x2b8] sm:$0xff]   ;;  %v4433_v59 = vld [vmem:[%s4262_s18 + $0x30] sm:$0xff] }
 0x4c0   : > { %1960 = vmatprep.subr.bf16.mxu1 %v3216_v60  ;;  %2003 = vmatprep.subr.bf16.mxu0 %v3218_v61  ;;  %v4436_v60 = vld [vmem:[%s4262_s18 + $0x70] sm:$0xff]  ;;  %v4439_v61 = vld [vmem:[%s4262_s18 + $0x38] sm:$0xff] }
 0x4c1   : > { %1990 = vmatprep.mubr.bf16.mxu1 %v3975_v32  ;;  %2033 = vmatprep.mubr.bf16.mxu0 %v3975_v32  ;;  %v3262_v62 = vcombine.high %v4433_v59, %v4436_v60  ;;  %v3261_v0 = vcombine.low %v4433_v59, %v4436_v60  ;;  %v3263_v3 = vcombine.low %v4439_v61, %v4444_v63 }
 0x4c3   : > { %1961 = vmatpush1.bf16.msra.mxu1 %v3215_v4  ;;  %2004 = vmatpush1.bf16.msra.mxu0 %v3217_v5  ;;  %v3264_v4 = vcombine.high %v4439_v61, %v4444_v63 }
 0x4c4   : > { %1962 = vmatprep.subr.bf16.mxu1 %v3220_v6  ;;  %2005 = vmatprep.subr.bf16.mxu0 %v3222_v7 }
 0x4c7   : > { %1963 = vmatpush1.bf16.msra.mxu1 %v3219_v23  ;;  %2006 = vmatpush1.bf16.msra.mxu0 %v3221_v24 }
 0x4c8   : > { %1964 = vmatprep.subr.bf16.mxu1 %v3224_v12  ;;  %2007 = vmatprep.subr.bf16.mxu0 %v3226_v13 }
 0x4cb   : > { %1965 = vmatpush1.bf16.msra.mxu1 %v3223_v14  ;;  %2008 = vmatpush1.bf16.msra.mxu0 %v3225_v15 }
 0x4cc   : > { %3420 = vmatprep.subr.bf16.mxu1 %v3700_v16  ;;  %3442 = vmatprep.subr.bf16.mxu0 %v3701_v17 }
 0x4ce   : > { %3227 = vmatmul.mubr.msk.bf16.vlgmr.msra.gmra.mrb[16].mxu1 %vm541_vm2, %v4371_v43  ;;  %3228 = vmatmul.mubr.msk.bf16.vlgmr.msra.gmra.mrb[20].mxu0 %vm541_vm2, %v4371_v43 }
 0x4cf   : > { %3421 = vmatpush3.bf16.msra.mxu1 %v3702_v18  ;;  %3443 = vmatpush3.bf16.msra.mxu0 %v3703_v19 }
 0x4d0   : > { %3422 = vmatprep.subr.bf16.mxu1 %v3704_v20  ;;  %3444 = vmatprep.subr.bf16.mxu0 %v3705_v21 }
 0x4d3   : > { %3423 = vmatpush3.bf16.msra.mxu1 %v3706_v22  ;;  %3445 = vmatpush3.bf16.msra.mxu0 %v3707_v25 }
 0x4d4   : > { %3424 = vmatprep.subr.bf16.mxu1 %v3708_v26  ;;  %3446 = vmatprep.subr.bf16.mxu0 %v3709_v27 }
 0x4d7   : > { %3425 = vmatpush3.bf16.msra.mxu1 %v3710_v28  ;;  %3447 = vmatpush3.bf16.msra.mxu0 %v3711_v33 }
 0x4d8   : > { %3426 = vmatprep.subr.bf16.mxu1 %v3712_v34  ;;  %3448 = vmatprep.subr.bf16.mxu0 %v3713_v35 }
 0x4db   : > { %3427 = vmatpush3.bf16.msra.mxu1 %v3714_v36  ;;  %3449 = vmatpush3.bf16.msra.mxu0 %v3715_v37 }
 0x4dc   : > { %3428 = vmatprep.subr.bf16.mxu1 %v3716_v38  ;;  %3450 = vmatprep.subr.bf16.mxu0 %v3717_v40  ;;  %v1792_v40 = vld [vmem:[%s4273_s15 + $0x8] sm:$0xf] }
 0x4df   : > { %3429 = vmatpush3.bf16.msra.mxu1 %v3718_v41  ;;  %3451 = vmatpush3.bf16.msra.mxu0 %v3719_v44  ;;  %v1861_v41 = vrot.slane %v1792_v40, %v4308_v30  ;;  %v1869_v44 = vrot.slane %v1792_v40, %v4355_v42 }
 0x4e0   : > { %3430 = vmatprep.subr.bf16.mxu1 %v3720_v45  ;;  %3452 = vmatprep.subr.bf16.mxu0 %v3721_v46  ;;  %v1865_v45 = vrot.slane %v1792_v40, %v4350_v39  ;;  %v1873_v46 = vrot.slane %v1792_v40, %v4393_v31 }
 0x4e3   : > { %3431 = vmatpush3.bf16.msra.mxu1 %v3722_v48  ;;  %3453 = vmatpush3.bf16.msra.mxu0 %v3723_v49 }
 0x4e4   : > { %3432 = vmatprep.subr.bf16.mxu1 %v3724_v50  ;;  %3454 = vmatprep.subr.bf16.mxu0 %v3725_v51 }
 0x4e7   : > { %3433 = vmatpush3.bf16.msra.mxu1 %v3726_v52  ;;  %3455 = vmatpush3.bf16.msra.mxu0 %v3727_v53 }
 0x4e8   : > { %3434 = vmatprep.subr.bf16.mxu1 %v3728_v54  ;;  %3456 = vmatprep.subr.bf16.mxu0 %v3729_v57 }
 0x4eb   : > { %3435 = vmatpush3.bf16.msra.mxu1 %v3730_v58  ;;  %3457 = vmatpush3.bf16.msra.mxu0 %v3731_v47 }
 0x4ec   : > { %2514 = vmatprep.subr.bf16.mxu1 %v3262_v62  ;;  %2557 = vmatprep.subr.bf16.mxu0 %v3264_v4 }
 0x571   : > { %v3348_v5 = vpop.f32.mrb[8].mxu1  ;;  %v3370_v6 = vpop.f32.mrb[12].mxu0 }
 0x572   : > { %v3349_v7 = vpop.f32.mrb[9].mxu1  ;;  %v3371_v8 = vpop.f32.mrb[13].mxu0 }
 0x573   : > { %v3350_v9 = vadd.f32 %v3349_v7, %v3348_v5  ;;  %v3372_v10 = vadd.f32 %v3371_v8, %v3370_v6  ;;  %v3351_v11 = vpop.f32.mrb[10].mxu1  ;;  %v3373_v23 = vpop.f32.mrb[14].mxu0 }
 0x574   : > { %v3352_v24 = vpop.f32.mrb[11].mxu1  ;;  %v3374_v12 = vpop.f32.mrb[15].mxu0 }
 0x575   : > { %v1496_v13 = vadd.f32 %v3372_v10, %v3350_v9  ;;  %v3353_v14 = vadd.f32 %v3352_v24, %v3351_v11  ;;  %v3375_v15 = vadd.f32 %v3374_v12, %v3373_v23  ;;  %v2336_v24 = vld [vmem:[%s4262_s18 + $0xb0] sm:$0xff] }
 0x576   : > { %v2338_v12 = vld [vmem:[%s4262_s18 + $0xf0] sm:$0xff] }
 0x577   : > { %v1499_v16 = vadd.f32 %v3375_v15, %v3353_v14 }
 0x591   : > { %v3392_v17 = vpop.f32.mrb[12].mxu1  ;;  %v3414_v18 = vpop.f32.mrb[16].mxu0 }
 0x592   : > { %v3393_v19 = vpop.f32.mrb[13].mxu1  ;;  %v3415_v20 = vpop.f32.mrb[17].mxu0 }
 0x593   : > { %v3394_v21 = vadd.f32 %v3393_v19, %v3392_v17  ;;  %v3416_v22 = vadd.f32 %v3415_v20, %v3414_v18  ;;  %v3395_v25 = vpop.f32.mrb[14].mxu1  ;;  %v3417_v26 = vpop.f32.mrb[18].mxu0  ;;  %v2337_v17 = vld [vmem:[%s4262_s18 + $0xb8] sm:$0xff] }
 0x594   : > { %v3396_v27 = vpop.f32.mrb[15].mxu1  ;;  %v3418_v28 = vpop.f32.mrb[19].mxu0  ;;  %v2339_v18 = vld [vmem:[%s4262_s18 + $0xf8] sm:$0xff] }
 0x595   : > { %v1729_v33 = vadd.f32 %v3394_v21, %v1496_v13  ;;  %v3397_v34 = vadd.f32 %v3396_v27, %v3395_v25  ;;  %v3419_v35 = vadd.f32 %v3418_v28, %v3417_v26  ;;  %v3266_v25 = vcombine.high %v2336_v24, %v2338_v12  ;;  %v2340_v27 = vld [vmem:[%s4262_s18 + $0x130] sm:$0xff] }
 0x596   : > { %v3268_v26 = vcombine.high %v2337_v17, %v2339_v18  ;;  %v2342_v28 = vld [vmem:[%s4262_s18 + $0x170] sm:$0xff] }
 0x597   : > { %v4452_v36 = vadd.f32 %v3416_v22, %v1729_v33  ;;  %v1732_v37 = vadd.f32 %v3397_v34, %v1499_v16  ;;  %v2341_v33 = vld [vmem:[%s4262_s18 + $0x138] sm:$0xff]  ;;  %v3270_v40 = vcombine.high %v2340_v27, %v2342_v28  ;;  %v3269_v59 = vcombine.low %v2340_v27, %v2342_v28 }
 0x598   : > { %v2343_v34 = vld [vmem:[%s4262_s18 + $0x178] sm:$0xff] }
 0x599   : > { %v4454_v38 = vadd.f32 %v3419_v35, %v1732_v37  ;;  %v3265_v35 = vcombine.low %v2336_v24, %v2338_v12  ;;  %v3267_v37 = vcombine.low %v2337_v17, %v2339_v18  ;;  %v3271_v60 = vcombine.low %v2341_v33, %v2343_v34  ;;  %v3753_v24 = vld [vmem:[#allocation9 + $0x3e8] sm:$0xff]   ;;  %v3759_v17 = vld [vmem:[#allocation9 + $0x3b0] sm:$0xff]   ;;  %v3760_v18 = vld [vmem:[#allocation9 + $0x378] sm:$0xff]  }
 0x59a   : > { %v3754_v12 = vld [vmem:[#allocation9 + $0x328] sm:$0xff]  }
 0x5a1   : > { %v1992_v48 = vpop.f32.mrb[16].mxu1  ;;  %v2035_v49 = vpop.f32.mrb[20].mxu0 }
 0x5a2   : > { %v1993_v50 = vadd.f32 %v1992_v48, %v1861_v41  ;;  %v2036_v51 = vadd.f32 %v2035_v49, %v1869_v44  ;;  %v1994_v52 = vpop.f32.mrb[17].mxu1  ;;  %v2037_v53 = vpop.f32.mrb[21].mxu0  ;;  %v2347_v48 = vld [vmem:[%s4262_s18 + $0x1f8] sm:$0xff]  ;;  %v3732_v49 = vld [vmem:[#allocation9 + $0x340] sm:$0xff]  }
 0x5a3   : > { %v1995_v54 = vadd.f32 %v1994_v52, %v1865_v45  ;;  %v2038_v57 = vadd.f32 %v2037_v53, %v1873_v46  ;;  %v1996_v58 = vpop.f32.mrb[18].mxu1  ;;  %v2039_v47 = vpop.f32.mrb[22].mxu0  ;;  %v3736_v52 = vld [vmem:[#allocation9 + $0x348] sm:$0xff]  }
 0x5a4   : > { %v1997_v62 = vadd.f32 %v1996_v58, %v1861_v41  ;;  %v2040_v4 = vadd.f32 %v2039_v47, %v1869_v44  ;;  %v1998_v5 = vpop.f32.mrb[19].mxu1  ;;  %v2041_v6 = vpop.f32.mrb[23].mxu0  ;;  %v2044_v9 = vmax.f32 %v1993_v50, 0.0  ;;  %v2046_v10 = vmax.f32 %v2036_v51, 0.0  ;;  %v2344_v44 = vld [vmem:[%s4262_s18 + $0x1b0] sm:$0xff]  ;;  %v3733_v50 = vld [vmem:[#allocation9 + $0x3c0] sm:$0xff]  }
 0x5a5   : > { %v1999_v7 = vadd.f32 %v1998_v5, %v1865_v45  ;;  %v2042_v8 = vadd.f32 %v2041_v6, %v1873_v46  ;;  %v2045_v13 = vmax.f32 %v1995_v54, 0.0  ;;  %v2047_v14 = vmax.f32 %v2038_v57, 0.0  ;;  %v2346_v45 = vld [vmem:[%s4262_s18 + $0x1f0] sm:$0xff]  ;;  %v2345_v46 = vld [vmem:[%s4262_s18 + $0x1b8] sm:$0xff]  ;;  %v3734_v51 = vld [vmem:[#allocation9 + $0x300] sm:$0xff]   ;;  %s4573_s18 = sld [smem:[#allocation16_spill]] (!%p3311_p6) }
 0x5a6   : > { %v2048_v11 = vmax.f32 %v1997_v62, 0.0  ;;  %v2050_v23 = vmax.f32 %v2040_v4, 0.0  ;;  %v3272_v41 = vcombine.high %v2341_v33, %v2343_v34  ;;  %v3274_v61 = vcombine.high %v2344_v44, %v2346_v45  ;;  %v3737_v53 = vld [vmem:[#allocation9 + $0x3c8] sm:$0xff]   ;;  %v3740_v58 = vld [vmem:[#allocation9 + $0x350] sm:$0xff]   ;;  %v3744_v5 = vld [vmem:[#allocation9 + $0x358] sm:$0xff]  }
 0x5a7   : > { %v2049_v15 = vmax.f32 %v1999_v7, 0.0  ;;  %v2051_v16 = vmax.f32 %v2042_v8, 0.0  ;;  %v3276_v63 = vcombine.high %v2345_v46, %v2347_v48  ;;  %v3738_v54 = vld [vmem:[#allocation9 + $0x308] sm:$0xff]   ;;  %v3741_v47 = vld [vmem:[#allocation9 + $0x3d0] sm:$0xff]   ;;  %v3745_v6 = vld [vmem:[#allocation9 + $0x3d8] sm:$0xff]  }
 0x5a8   : > { %v2052_v19 = vpack.c.bf16 %v2048_v11, %v2044_v9  ;;  %v2054_v20 = vpack.c.bf16 %v2050_v23, %v2046_v10  ;;  %v3739_v57 = vld [vmem:[#allocation9 + $0x388] sm:$0xff]   ;;  %v3742_v62 = vld [vmem:[#allocation9 + $0x310] sm:$0xff]   ;;  %v3746_v7 = vld [vmem:[#allocation9 + $0x318] sm:$0xff]  }
 0x5a9   : > { %v2053_v21 = vpack.c.bf16 %v2049_v15, %v2045_v13  ;;  %v2055_v22 = vpack.c.bf16 %v2051_v16, %v2047_v14  ;;  %v3743_v4 = vld [vmem:[#allocation9 + $0x390] sm:$0xff]   ;;  %v3748_v8 = vld [vmem:[#allocation9 + $0x360] sm:$0xff]   ;;  %v3752_v23 = vld [vmem:[#allocation9 + $0x368] sm:$0xff]  }
 0x5aa   : > { %v3749_v9 = vld [vmem:[#allocation9 + $0x3e0] sm:$0xff]   ;;  %v3755_v13 = vld [vmem:[#allocation9 + $0x3a8] sm:$0xff]   ;;  %v3756_v14 = vld [vmem:[#allocation9 + $0x370] sm:$0xff]  }
 0x5ab   : > { %2280 = vmatprep.mubr.bf16.mxu1 %v2053_v21  ;;  %2321 = vmatprep.mubr.bf16.mxu0 %v2055_v22  ;;  %v3750_v10 = vld [vmem:[#allocation9 + $0x320] sm:$0xff]   ;;  %v3757_v15 = vld [vmem:[#allocation9 + $0x3f0] sm:$0xff]   ;;  %v3763_v21 = vld [vmem:[#allocation9 + $0x3b8] sm:$0xff]  }
 0x5ac   : > { %2281 = vmatmul.mubr.bf16.vlgmr.msra.gmra.mrb[20].mxu1 %v2052_v19  ;;  %2322 = vmatmul.mubr.bf16.vlgmr.msra.gmra.mrb[24].mxu0 %v2054_v20  ;;  %v3751_v11 = vld [vmem:[#allocation9 + $0x3a0] sm:$0xff]   ;;  %v3758_v16 = vld [vmem:[#allocation9 + $0x330] sm:$0xff]   ;;  %v3761_v19 = vld [vmem:[#allocation9 + $0x3f8] sm:$0xff]  }
 0x5ad   : > { %2515 = vmatpush1.bf16.msra.mxu1 %v3261_v0  ;;  %2558 = vmatpush1.bf16.msra.mxu0 %v3263_v3  ;;  %v3273_v0 = vcombine.low %v2344_v44, %v2346_v45  ;;  %v3275_v3 = vcombine.low %v2345_v46, %v2347_v48  ;;  %v3762_v20 = vld [vmem:[#allocation9 + $0x338] sm:$0xff]  }
 0x5ae   : > { %2516 = vmatprep.subr.bf16.mxu1 %v3266_v25  ;;  %2559 = vmatprep.subr.bf16.mxu0 %v3268_v26 }
 0x5af   : > { %2546 = vmatprep.mubr.bf16.mxu1 %v3975_v32  ;;  %2589 = vmatprep.mubr.bf16.mxu0 %v3975_v32  ;;  %v3735_v32 = vld [vmem:[#allocation9 + $0x380] sm:$0xff]  }
 0x5b1   : > { %2517 = vmatpush1.bf16.msra.mxu1 %v3265_v35  ;;  %2560 = vmatpush1.bf16.msra.mxu0 %v3267_v37 }
 0x5b2   : > { %2518 = vmatprep.subr.bf16.mxu1 %v3270_v40  ;;  %2561 = vmatprep.subr.bf16.mxu0 %v3272_v41 }
 0x5b5   : > { %2519 = vmatpush1.bf16.msra.mxu1 %v3269_v59  ;;  %2562 = vmatpush1.bf16.msra.mxu0 %v3271_v60  ;;  %v2348_v60 = vld [vmem:[%s4273_s15 + $0xc] sm:$0xf] }
 0x5b6   : > { %2520 = vmatprep.subr.bf16.mxu1 %v3274_v61  ;;  %2563 = vmatprep.subr.bf16.mxu0 %v3276_v63  ;;  %v2417_v61 = vrot.slane %v2348_v60, %v4308_v30  ;;  %v2425_v63 = vrot.slane %v2348_v60, %v4355_v42 }
 0x5b9   : > { %2521 = vmatpush1.bf16.msra.mxu1 %v3273_v0  ;;  %2564 = vmatpush1.bf16.msra.mxu0 %v3275_v3  ;;  %v2421_v0 = vrot.slane %v2348_v60, %v4350_v39  ;;  %v2429_v3 = vrot.slane %v2348_v60, %v4393_v31 }
 0x5ba   : > { %3464 = vmatprep.subr.bf16.mxu1 %v3732_v49  ;;  %3486 = vmatprep.subr.bf16.mxu0 %v3733_v50 }
 0x5bc   : > { %3277 = vmatmul.mubr.msk.bf16.vlgmr.msra.gmra.mrb[24].mxu1 %vm541_vm2, %v4371_v43  ;;  %3278 = vmatmul.mubr.msk.bf16.vlgmr.msra.gmra.mrb[28].mxu0 %vm541_vm2, %v4371_v43  ;;  %v3747_v43 = vld [vmem:[#allocation9 + $0x398] sm:$0xff]  }
 0x5bd   : > { %3465 = vmatpush3.bf16.msra.mxu1 %v3734_v51  ;;  %3487 = vmatpush3.bf16.msra.mxu0 %v3735_v32 }
 0x5be   : > { %3466 = vmatprep.subr.bf16.mxu1 %v3736_v52  ;;  %3488 = vmatprep.subr.bf16.mxu0 %v3737_v53 }
 0x5c1   : > { %3467 = vmatpush3.bf16.msra.mxu1 %v3738_v54  ;;  %3489 = vmatpush3.bf16.msra.mxu0 %v3739_v57 }
 0x5c2   : > { %3468 = vmatprep.subr.bf16.mxu1 %v3740_v58  ;;  %3490 = vmatprep.subr.bf16.mxu0 %v3741_v47 }
 0x5c5   : > { %3469 = vmatpush3.bf16.msra.mxu1 %v3742_v62  ;;  %3491 = vmatpush3.bf16.msra.mxu0 %v3743_v4 }
 0x5c6   : > { %3470 = vmatprep.subr.bf16.mxu1 %v3744_v5  ;;  %3492 = vmatprep.subr.bf16.mxu0 %v3745_v6 }
 0x5c9   : > { %3471 = vmatpush3.bf16.msra.mxu1 %v3746_v7  ;;  %3493 = vmatpush3.bf16.msra.mxu0 %v3747_v43 }
 0x5ca   : > { %3472 = vmatprep.subr.bf16.mxu1 %v3748_v8  ;;  %3494 = vmatprep.subr.bf16.mxu0 %v3749_v9 }
 0x5cd   : > { %3473 = vmatpush3.bf16.msra.mxu1 %v3750_v10  ;;  %3495 = vmatpush3.bf16.msra.mxu0 %v3751_v11 }
 0x5ce   : > { %3474 = vmatprep.subr.bf16.mxu1 %v3752_v23  ;;  %3496 = vmatprep.subr.bf16.mxu0 %v3753_v24 }
 0x5d1   : > { %3475 = vmatpush3.bf16.msra.mxu1 %v3754_v12  ;;  %3497 = vmatpush3.bf16.msra.mxu0 %v3755_v13 }
 0x5d2   : > { %3476 = vmatprep.subr.bf16.mxu1 %v3756_v14  ;;  %3498 = vmatprep.subr.bf16.mxu0 %v3757_v15 }
 0x5d5   : > { %3477 = vmatpush3.bf16.msra.mxu1 %v3758_v16  ;;  %3499 = vmatpush3.bf16.msra.mxu0 %v3759_v17 }
 0x5d6   : > { %3478 = vmatprep.subr.bf16.mxu1 %v3760_v18  ;;  %3500 = vmatprep.subr.bf16.mxu0 %v3761_v19 }
 0x5d9   : > { %3479 = vmatpush3.bf16.msra.mxu1 %v3762_v20  ;;  %3501 = vmatpush3.bf16.msra.mxu0 %v3763_v21 }
 0x67f   : > { %v3436_v22 = vpop.f32.mrb[20].mxu1  ;;  %v3458_v25 = vpop.f32.mrb[24].mxu0 }
 0x680   : > { %v3437_v26 = vpop.f32.mrb[21].mxu1  ;;  %v3459_v27 = vpop.f32.mrb[25].mxu0 }
 0x681   : > { %v3438_v28 = vadd.f32 %v3437_v26, %v3436_v22  ;;  %v3460_v33 = vadd.f32 %v3459_v27, %v3458_v25  ;;  %v3439_v34 = vpop.f32.mrb[22].mxu1  ;;  %v3461_v35 = vpop.f32.mrb[26].mxu0 }
 0x682   : > { %v3440_v37 = vpop.f32.mrb[23].mxu1  ;;  %v3462_v40 = vpop.f32.mrb[27].mxu0 }
 0x683   : > { %v2324_v41 = vadd.f32 %v3460_v33, %v3438_v28  ;;  %v3441_v44 = vadd.f32 %v3440_v37, %v3439_v34  ;;  %v3463_v45 = vadd.f32 %v3462_v40, %v3461_v35  ;;  %v2889_v35 = vstv %s2888_s16  ;;  %v3772_v37 = vld [vmem:[%s4278_s27] sm:$0x3f] }
 0x684   : > { %vm2890_vm3 = vcmp.eq.s32.totalorder %v2889_v35, 1  ;;  %v2904_v40 = vrot.slane %v3772_v37, %v4393_v31 }
 0x685   : > { %v2330_v46 = vadd.f32 %v2324_v41, %v4452_v36  ;;  %v2327_v48 = vadd.f32 %v3463_v45, %v3441_v44 }
 0x687   : > { %v2331_v59 = vadd.f32 %v2327_v48, %v4454_v38 }
 0x68f   : > { %v2548_v49 = vpop.f32.mrb[24].mxu1  ;;  %v2591_v50 = vpop.f32.mrb[28].mxu0 }
 0x690   : > { %v2549_v51 = vadd.f32 %v2548_v49, %v2417_v61  ;;  %v2592_v32 = vadd.f32 %v2591_v50, %v2425_v63  ;;  %v2550_v52 = vpop.f32.mrb[25].mxu1  ;;  %v2593_v53 = vpop.f32.mrb[29].mxu0 }
 0x691   : > { %v2551_v54 = vadd.f32 %v2550_v52, %v2421_v0  ;;  %v2594_v36 = vadd.f32 %v2593_v53, %v2429_v3  ;;  %v2552_v57 = vpop.f32.mrb[26].mxu1  ;;  %v2595_v58 = vpop.f32.mrb[30].mxu0 }
 0x692   : > { %v2553_v38 = vadd.f32 %v2552_v57, %v2417_v61  ;;  %v2596_v47 = vadd.f32 %v2595_v58, %v2425_v63  ;;  %v2554_v62 = vpop.f32.mrb[27].mxu1  ;;  %v2597_v30 = vpop.f32.mrb[31].mxu0  ;;  %v2600_v5 = vmax.f32 %v2549_v51, 0.0  ;;  %v2602_v39 = vmax.f32 %v2592_v32, 0.0 }
 0x693   : > { %v2555_v4 = vadd.f32 %v2554_v62, %v2421_v0  ;;  %v2598_v42 = vadd.f32 %v2597_v30, %v2429_v3  ;;  %v2601_v43 = vmax.f32 %v2551_v54, 0.0  ;;  %v2603_v8 = vmax.f32 %v2594_v36, 0.0 }
 0x694   : > { %v2604_v6 = vmax.f32 %v2553_v38, 0.0  ;;  %v2606_v7 = vmax.f32 %v2596_v47, 0.0  ;;  %v2937_v62 = vsub.s32 4, %v4305_v29  ;;  %v2943_v30 = vsub.s32 5, %v4305_v29 }
 0x695   : > { %v2605_v9 = vmax.f32 %v2555_v4, 0.0  ;;  %v2607_v10 = vmax.f32 %v2598_v42, 0.0 }
 0x696   : > { %v2608_v11 = vpack.c.bf16 %v2604_v6, %v2600_v5  ;;  %v2610_v23 = vpack.c.bf16 %v2606_v7, %v2602_v39  ;;  %v2938_v4 = vrot.slane %v3772_v37, %v2937_v62  ;;  %v2944_v5 = vrot.slane %v3772_v37, %v2943_v30 }
 0x697   : > { %v2609_v24 = vpack.c.bf16 %v2605_v9, %v2601_v43  ;;  %v2611_v12 = vpack.c.bf16 %v2607_v10, %v2603_v8 }
 0x699   : > { %2836 = vmatprep.mubr.bf16.mxu1 %v2609_v24  ;;  %2877 = vmatprep.mubr.bf16.mxu0 %v2611_v12 }
 0x69a   : > { %2837 = vmatmul.mubr.bf16.vlgmr.msra.gmra.mrb[28].mxu1 %v2608_v11  ;;  %2878 = vmatmul.mubr.bf16.vlgmr.msra.gmra.mrb[32].mxu0 %v2610_v23 }
 0x76d   : > { %v3480_v13 = vpop.f32.mrb[28].mxu1  ;;  %v3502_v14 = vpop.f32.mrb[32].mxu0 }
 0x76e   : > { %v3481_v15 = vpop.f32.mrb[29].mxu1  ;;  %v3503_v16 = vpop.f32.mrb[33].mxu0 }
 0x76f   : > { %v3482_v17 = vadd.f32 %v3481_v15, %v3480_v13  ;;  %v3504_v18 = vadd.f32 %v3503_v16, %v3502_v14  ;;  %v3483_v19 = vpop.f32.mrb[30].mxu1  ;;  %v3505_v20 = vpop.f32.mrb[34].mxu0 }
 0x770   : > { %v3484_v21 = vpop.f32.mrb[31].mxu1  ;;  %v3506_v22 = vpop.f32.mrb[35].mxu0 }
 0x771   : > { %v2880_v25 = vadd.f32 %v3504_v18, %v3482_v17  ;;  %v3485_v26 = vadd.f32 %v3484_v21, %v3483_v19  ;;  %v3507_v27 = vadd.f32 %v3506_v22, %v3505_v20 }
 0x773   : > { %v2883_v28 = vadd.f32 %v3507_v27, %v3485_v26  ;;  %v2886_v33 = vadd.f32 %v2880_v25, %v2330_v46 }
 0x775   : > { %2893 = vrot.lane.b32.xlu0 %v2886_v33, %s3976_s22  ;;  %v2887_v34 = vadd.f32 %v2883_v28, %v2331_v59 }
 0x777   : > { %2895 = vrot.lane.b32.xlu1 %v2887_v34, %s3976_s22 }
 0x7e7   : > { %v2894_v41 = vpop.permute.xlu0 %2893 }
 0x7e8   : > { %v2899_v44 = vsel %vm2890_vm3, %v2886_v33, %v2894_v41 }
 0x7e9   : > { %v2905_v45 = vadd.f32 %v2904_v40, %v2899_v44  ;;  %v2896_v48 = vpop.permute.xlu1 %2895 }
 0x7ea   : > { %v2900_v60 = vsel %vm2890_vm3, %v2887_v34, %v2896_v48 }
 0x7eb   : > { %v2906_v61 = vadd.f32 %v2904_v40, %v2900_v60  ;;  %v2907_v63 = vadd.f32 %v2905_v45, %v4365_v55 }
 0x7ed   : > { %v2909_v46 = vsel %vm541_vm2, %v2907_v63, 0.0  ;;  %v2908_v59 = vadd.f32 %v2906_v61, %v4367_v56 }
 0x7ee   : > { %2910 = vadd.xlane.f32.xlu1 %v2909_v46 }
 0x7ef   : > { %v2912_v0 = vsel %vm541_vm2, %v2908_v59, 0.0 }
 0x7f0   : > { %2913 = vadd.xlane.f32.xlu0 %v2912_v0 }
 0x87b   : > { %v2911_v3 = vpop.xlane.xlu1 %2910 }
 0x87c   : > { %v2915_v49 = vmul.f32 0.015625, %v2911_v3 }
 0x87d   : > { %v2914_v50 = vpop.xlane.xlu0 %2913 }
 0x87e   : > { %v2917_v31 = vsub.f32 %v2907_v63, %v2915_v49  ;;  %v2916_v51 = vmul.f32 0.015625, %v2914_v50 }
 0x880   : > { %v2918_v32 = vsub.f32 %v2908_v59, %v2916_v51  ;;  %v2919_v52 = vmul.f32 %v2917_v31, %v2917_v31 }
 0x882   : > { %v2921_v53 = vsel %vm541_vm2, %v2919_v52, 0.0  ;;  %v2920_v54 = vmul.f32 %v2918_v32, %v2918_v32 }
 0x883   : > { %2922 = vadd.xlane.f32.xlu0 %v2921_v53 }
 0x884   : > { %v2924_v55 = vsel %vm541_vm2, %v2920_v54, 0.0 }
 0x885   : > { %2925 = vadd.xlane.f32.xlu1 %v2924_v55 }
 0x910   : > { %v2923_v36 = vpop.xlane.xlu0 %2922 }
 0x911   : > { %v2927_v56 = vmul.f32 0.015625, %v2923_v36 }
 0x912   : > { %v2926_v57 = vpop.xlane.xlu1 %2925 }
 0x913   : > { %v2929_v58 = vadd.f32 1e-05, %v2927_v56  ;;  %v2928_v38 = vmul.f32 0.015625, %v2926_v57 }
 0x915   : > { %3768 = vrsqrt.f32 %v2929_v58  ;;  %v2930_v47 = vadd.f32 1e-05, %v2928_v38 }
 0x917   : > { %3770 = vrsqrt.f32 %v2930_v47 }
 0x91f   : > { %v3769_v42 = vpop.eup %3768 }
 0x920   : > { %v2933_v39 = vmul.f32 %v3769_v42, %v2917_v31 }
 0x921   : > { %v3771_v6 = vpop.eup %3770 }
 0x922   : > { %v2939_v7 = vmul.f32 %v2938_v4, %v2933_v39  ;;  %v2934_v43 = vmul.f32 %v3771_v6, %v2918_v32  ;;  %2952 = sbr.rel (%p3311_p6) target bundleno = 2494 (0x9be), region = 80 }
 0x924   : > { %v2945_v8 = vadd.f32 %v2944_v5, %v2939_v7  ;;  %v2940_v9 = vmul.f32 %v2938_v4, %v2934_v43 }
 0x926   : > { %2947 = vst.msk [vmem:[#allocation2] sm:$0xff] %vm541_vm2, %v2945_v8  ;;  %v2946_v10 = vadd.f32 %v2944_v5, %v2940_v9  ;;  %v2957_v11 = vmul.f32 (!%p3311_p6), %v4286_v1, %v2945_v8 }
 0x928   : > { %2948 = vst.msk [vmem:[#allocation2 + $0x8] sm:$0xff] %vm541_vm2, %v2946_v10  ;;  %v2958_v29 = vmul.f32 (!%p3311_p6), %v4286_v1, %v2946_v10  ;;  %v2959_v23 = vsel (!%p3311_p6), %vm541_vm2, %v2957_v11, 0.0 }
 0x929   : > { %2960 = vadd.xlane.f32.xlu0 %v2959_v23 }
 0x92a   : > { %v2962_v24 = vsel %vm541_vm2, %v2958_v29, 0.0 }
 0x92d   : > { %2963 = vadd.xlane.f32.xlu0 %v2962_v24 }
 0x9b6   : > { %v2961_v12 = vpop.xlane.xlu0 %2960 }
 0x9b7   : > { %v2969_v13 = vadd.f32 %v4291_v2, %v2961_v12 }
 0x9b9   : > { %2972 = vst.msk [vmem:[%s4573_s18] sm:$0xff] %vm2971_vm4, %v2969_v13 }
 0x9ba   : > { %v2964_v14 = vpop.xlane.xlu0 %2963 }
 0x9bb   : > { %v2970_v15 = vadd.f32 %v4291_v2, %v2964_v14 }
 0x9bd   : > { %2973 = vst.msk [vmem:[%s4573_s18 + $0x8] sm:$0xff] %vm2971_vm4, %v2970_v15 }
 0x9be PF: > { %s4574_s30 = sld [smem:[#allocation14_spill]]  ;;  %s4575_s20 = sld [smem:[#allocation15_spill]] }
 0x9bf   : > { %s4576_s27 = smov %s3955_s28  ;;  %s4577_s28 = smov %s3959_s29 }
 0x9c4   : > { %p17_p11 = scmp.ge.s32.totalorder %s4574_s30, 4   ;;  %s4578_s29 = smov %s4575_s20 }
 0x9c6   :  { %19 = sbr.rel (!%p17_p11) target bundleno = 5 (0x5), region = 124 }
 0x9cd   :  { %2985 = vsyncpa [#allocation4], 1 }
 0x9ce   :  { %2987 = vsyncpa [#allocation4 + $0x1], 1 }
 0x9cf   :  { %2988 = vsyncpa [#allocation6], 1 }

</bundles_post_ra>
